<compile_context>
chip_gen: v6e
topology: v6e:2x2x1
jax: 0.10.0
libtpu: 0.0.40
codegen_flags: <defaults>
</compile_context>

<pallas_src>
import functools

import jax
import jax.numpy as jnp
from jax.experimental import pallas as pl
from jax.experimental.pallas import tpu as pltpu

LANE = 128


def _round_up(n, m):
    return ((n + m - 1) // m) * m


def _pick_batch_tile(B, max_tile=2048):
    """Pick the batch tile.

    Small/medium B: split into 2 grid steps so both v7x TensorCores get a shard
    (on single-TC v5e/v6e the extra step is ~0.35us -- negligible).
    Large B: cap the tile at `max_tile` rows; double-buffered activations stay a
    few MiB, far under VMEM on every generation.
    """
    B8 = _round_up(max(B, 1), 8)
    if B8 <= 2 * max_tile:
        return max(_round_up((B8 + 1) // 2, 8), 8)
    return max_tile


def _layernorm_padded(h, gamma, beta, true_n, eps=1e-5):
    """LayerNorm over the last axis where only the first `true_n` lanes are real.

    Requires padded lanes of `h` to be exactly zero (see invariant above).
    Uses a closed-form padded-lane correction instead of a lane mask:
        sum_all((h-mu)^2) = sum_true((h-mu)^2) + (P-T)*mu^2
    Padded gamma/beta lanes are zero, so padded output lanes stay zero.
    """
    padded_n = h.shape[-1]
    inv_n = 1.0 / float(true_n)
    mu = jnp.sum(h, axis=-1, keepdims=True) * inv_n
    centered = h - mu
    sq = jnp.sum(centered * centered, axis=-1, keepdims=True)
    if padded_n != true_n:
        sq = sq - float(padded_n - true_n) * (mu * mu)
    var = sq * inv_n
    return centered * jax.lax.rsqrt(var + eps) * gamma + beta


def temporal_mlp_kernel(
    x_ref,       # (T, D_in)
    w1_ref,      # (D_in, H0p)
    v1_ref,      # (3, H0p)  rows: bias, gamma, beta
    w2_ref,      # (H0p, H1p)
    v2_ref,      # (3, H1p)
    w3_ref,      # (H1p, D_out)  true output width (no lane padding)
    b3_ref,      # (1, D_out)
    o_ref,       # (T, D_out)
    *, h0_true, h1_true,
):
    x = x_ref[...]

    # Layer 1: Linear -> ReLU -> LayerNorm -> (Dropout = identity at eval)
    h = jnp.dot(x, w1_ref[...], preferred_element_type=jnp.float32) + v1_ref[0:1, :]
    h = jnp.maximum(h, 0.0)
    h = _layernorm_padded(h, v1_ref[1:2, :], v1_ref[2:3, :], h0_true)

    # Layer 2: Linear -> ReLU -> LayerNorm -> (Dropout = identity at eval)
    h = jnp.dot(h, w2_ref[...], preferred_element_type=jnp.float32) + v2_ref[0:1, :]
    h = jnp.maximum(h, 0.0)
    h = _layernorm_padded(h, v2_ref[1:2, :], v2_ref[2:3, :], h1_true)

    # Output layer: Linear (true 16-lane output -> 8x fewer writeback bytes)
    out = jnp.dot(h, w3_ref[...], preferred_element_type=jnp.float32) + b3_ref[...]
    o_ref[...] = out.astype(o_ref.dtype)


def pack_params(params):
    """Pad/pack the parameter set ONCE (outside the per-call forward).

    Hidden widths are zero-padded to 128 lanes (lane-dense matmuls / LN); the
    output width is left at its true size.  Per-layer (bias, gamma, beta) are
    packed into one (3, H) slab to cut pallas_call inputs / DMA bookkeeping.
    """
    D_in, H0 = params["w1"].shape
    H1 = params["w2"].shape[1]
    D_out = params["w3"].shape[1]
    H0p = _round_up(H0, LANE)
    H1p = _round_up(H1, LANE)

    def pad2(a, rows, cols):
        return jnp.pad(a, ((0, rows - a.shape[0]), (0, cols - a.shape[1])))

    return {
        "w1": pad2(params["w1"], D_in, H0p),
        "v1": pad2(jnp.concatenate([params["b1"], params["g1"], params["be1"]], axis=0), 3, H0p),
        "w2": pad2(params["w2"], H0p, H1p),
        "v2": pad2(jnp.concatenate([params["b2"], params["g2"], params["be2"]], axis=0), 3, H1p),
        "w3": pad2(params["w3"], H1p, D_out),
        "b3": params["b3"],
        "dims": (D_in, H0, H1, D_out, H0p, H1p),
    }


def temporal_network_forward(x, packed, *, max_batch_tile=2048):
    """x: [B, input_size] float32. packed: output of pack_params()."""
    B, D_in = x.shape
    D_in_p, H0, H1, D_out, H0p, H1p = packed["dims"]
    assert D_in == D_in_p, "input width mismatch"

    batch_tile = _pick_batch_tile(B, max_batch_tile)
    B_pad = _round_up(B, batch_tile)
    if B_pad != B:
        x = jnp.pad(x, ((0, B_pad - B), (0, 0)))

    grid = (B_pad // batch_tile,)
    kernel = functools.partial(temporal_mlp_kernel, h0_true=H0, h1_true=H1)

    out = pl.pallas_call(
        kernel,
        out_shape=jax.ShapeDtypeStruct((B_pad, D_out), jnp.float32),
        grid_spec=pltpu.PrefetchScalarGridSpec(
            num_scalar_prefetch=0,
            grid=grid,
            in_specs=[
                pl.BlockSpec((batch_tile, D_in), lambda i: (i, 0)),   # x tile (D_in kept unpadded)
                pl.BlockSpec((D_in, H0p), lambda i: (0, 0)),          # w1 (resident)
                pl.BlockSpec((3, H0p), lambda i: (0, 0)),             # b1/g1/be1 slab
                pl.BlockSpec((H0p, H1p), lambda i: (0, 0)),           # w2
                pl.BlockSpec((3, H1p), lambda i: (0, 0)),             # b2/g2/be2 slab
                pl.BlockSpec((H1p, D_out), lambda i: (0, 0)),         # w3 (true output width)
                pl.BlockSpec((1, D_out), lambda i: (0, 0)),           # b3
            ],
            out_specs=pl.BlockSpec((batch_tile, D_out), lambda i: (i, 0)),
        ),
        compiler_params=pltpu.CompilerParams(
            dimension_semantics=("parallel",),
        ),
    )(x, packed["w1"], packed["v1"], packed["w2"], packed["v2"], packed["w3"], packed["b3"])

    return out if B_pad == B else out[:B]


def init_params(key, input_size, hidden_sizes, output_size):
    """Deterministic init matching the module: xavier_normal_ weights, zero biases,
    LayerNorm gamma=1, beta=0. Weights stored as [in, out] (pre-transposed)."""
    h0, h1 = hidden_sizes
    k1, k2, k3 = jax.random.split(key, 3)

    def xavier_normal(k, fan_in, fan_out):
        std = (2.0 / (fan_in + fan_out)) ** 0.5
        return std * jax.random.normal(k, (fan_in, fan_out), dtype=jnp.float32)

    return {
        "w1": xavier_normal(k1, input_size, h0),
        "b1": jnp.zeros((1, h0), jnp.float32),
        "g1": jnp.ones((1, h0), jnp.float32),
        "be1": jnp.zeros((1, h0), jnp.float32),
        "w2": xavier_normal(k2, h0, h1),
        "b2": jnp.zeros((1, h1), jnp.float32),
        "g2": jnp.ones((1, h1), jnp.float32),
        "be2": jnp.zeros((1, h1), jnp.float32),
        "w3": xavier_normal(k3, h1, output_size),
        "b3": jnp.zeros((1, output_size), jnp.float32),
    }


def _reference_forward(x, p):
    # Pure-JAX reference (eval-mode dropout = identity).
    def ln(h, g, b, eps=1e-5):
        mu = jnp.mean(h, axis=-1, keepdims=True)
        var = jnp.mean((h - mu) ** 2, axis=-1, keepdims=True)
        return (h - mu) / jnp.sqrt(var + eps) * g + b

    h = jnp.maximum(x @ p["w1"] + p["b1"], 0.0)
    h = ln(h, p["g1"], p["be1"])
    h = jnp.maximum(h @ p["w2"] + p["b2"], 0.0)
    h = ln(h, p["g2"], p["be2"])
    return h @ p["w3"] + p["b3"]


if __name__ == "__main__":
    input_size = 32
    hidden_sizes = (64, 48)
    output_size = 16
    batch = 512  # -> batch_tile=256, grid=(2,): both v7x TCs busy, ~free on v5e/v6e

    key = jax.random.PRNGKey(0)
    kx, kp = jax.random.split(key)
    x = jax.random.normal(kx, (batch, input_size), dtype=jnp.float32)
    params = init_params(kp, input_size, hidden_sizes, output_size)
    packed = pack_params(params)  # pad/pack once, not per call

    out = temporal_network_forward(x, packed)
    out = jax.block_until_ready(out)

    ref = _reference_forward(x, params)
    assert out.shape == (batch, output_size)
    assert jnp.allclose(out, ref, atol=2e-4, rtol=2e-4), "mismatch vs JAX reference"

    print("KERNEL_OK")
</pallas_src>

<mosaic_0001>
module attributes {stable_mosaic.version = 11 : i64} {
  func.func @temporal_mlp_kernel(%arg0: i32, %arg1: memref<256x32xf32, #tpu.memory_space<vmem>>, %arg2: memref<32x128xf32, #tpu.memory_space<vmem>>, %arg3: memref<3x128xf32, #tpu.memory_space<vmem>>, %arg4: memref<128x128xf32, #tpu.memory_space<vmem>>, %arg5: memref<3x128xf32, #tpu.memory_space<vmem>>, %arg6: memref<128x16xf32, #tpu.memory_space<vmem>>, %arg7: memref<1x16xf32, #tpu.memory_space<vmem>>, %arg8: memref<256x16xf32, #tpu.memory_space<vmem>>) attributes {dimension_semantics = [#tpu.dimension_semantics<parallel>], iteration_bounds = array<i64: 2>, scalar_prefetch = 0 : i64, scratch_operands = 0 : i64, tpu.core_type = #tpu.core_type<tc>, window_params = [{transform_indices = @transform_0, window_bounds = array<i64: 256, 32>}, {pipeline_mode = #tpu.pipeline_mode<synchronous>, transform_indices = @transform_1, window_bounds = array<i64: 32, 128>}, {pipeline_mode = #tpu.pipeline_mode<synchronous>, transform_indices = @transform_2, window_bounds = array<i64: 3, 128>}, {pipeline_mode = #tpu.pipeline_mode<synchronous>, transform_indices = @transform_3, window_bounds = array<i64: 128, 128>}, {pipeline_mode = #tpu.pipeline_mode<synchronous>, transform_indices = @transform_4, window_bounds = array<i64: 3, 128>}, {pipeline_mode = #tpu.pipeline_mode<synchronous>, transform_indices = @transform_5, window_bounds = array<i64: 128, 16>}, {pipeline_mode = #tpu.pipeline_mode<synchronous>, transform_indices = @transform_6, window_bounds = array<i64: 1, 16>}, {transform_indices = @transform_7, window_bounds = array<i64: 256, 16>}]} {
    %c0 = arith.constant 0 : index
    %c0_0 = arith.constant 0 : index
    %0 = vector.load %arg1[%c0, %c0_0] : memref<256x32xf32, #tpu.memory_space<vmem>>, vector<256x32xf32>
    %c0_1 = arith.constant 0 : index
    %c0_2 = arith.constant 0 : index
    %1 = vector.load %arg2[%c0_1, %c0_2] : memref<32x128xf32, #tpu.memory_space<vmem>>, vector<32x128xf32>
    %cst = arith.constant dense<0.000000e+00> : vector<256x128xf32>
    %2 = tpu.matmul %0, %1, %cst {dimension_numbers = #tpu.dot_dimension_numbers<[1], [0], [0], [1], [0, 0, 1, 1], [], []>} : vector<256x32xf32>, vector<32x128xf32>, vector<256x128xf32> -> vector<256x128xf32>
    %c0_3 = arith.constant 0 : index
    %c0_4 = arith.constant 0 : index
    %3 = vector.load %arg3[%c0_3, %c0_4] : memref<3x128xf32, #tpu.memory_space<vmem>>, vector<1x128xf32>
    %4 = vector.broadcast %3 : vector<1x128xf32> to vector<256x128xf32>
    %5 = arith.addf %2, %4 : vector<256x128xf32>
    %cst_5 = arith.constant 0.000000e+00 : f32
    %6 = vector.broadcast %cst_5 : f32 to vector<256x128xf32>
    %7 = arith.maximumf %5, %6 : vector<256x128xf32>
    %c1 = arith.constant 1 : index
    %c0_6 = arith.constant 0 : index
    %8 = vector.load %arg3[%c1, %c0_6] : memref<3x128xf32, #tpu.memory_space<vmem>>, vector<1x128xf32>
    %c2 = arith.constant 2 : index
    %c0_7 = arith.constant 0 : index
    %9 = vector.load %arg3[%c2, %c0_7] : memref<3x128xf32, #tpu.memory_space<vmem>>, vector<1x128xf32>
    %cst_8 = arith.constant dense<0.000000e+00> : vector<256xf32>
    %10 = vector.multi_reduction <add>, %7, %cst_8 [1] : vector<256x128xf32> to vector<256xf32>
    %11 = vector.shape_cast %10 : vector<256xf32> to vector<256x1xf32>
    %cst_9 = arith.constant 1.562500e-02 : f32
    %12 = vector.broadcast %cst_9 : f32 to vector<256x1xf32>
    %13 = arith.mulf %11, %12 : vector<256x1xf32>
    %14 = vector.broadcast %13 : vector<256x1xf32> to vector<256x128xf32>
    %15 = arith.subf %7, %14 : vector<256x128xf32>
    %16 = arith.mulf %15, %15 : vector<256x128xf32>
    %cst_10 = arith.constant dense<0.000000e+00> : vector<256xf32>
    %17 = vector.multi_reduction <add>, %16, %cst_10 [1] : vector<256x128xf32> to vector<256xf32>
    %18 = vector.shape_cast %17 : vector<256xf32> to vector<256x1xf32>
    %19 = arith.mulf %13, %13 : vector<256x1xf32>
    %cst_11 = arith.constant 6.400000e+01 : f32
    %20 = vector.broadcast %cst_11 : f32 to vector<256x1xf32>
    %21 = arith.mulf %20, %19 : vector<256x1xf32>
    %22 = arith.subf %18, %21 : vector<256x1xf32>
    %cst_12 = arith.constant 1.562500e-02 : f32
    %23 = vector.broadcast %cst_12 : f32 to vector<256x1xf32>
    %24 = arith.mulf %22, %23 : vector<256x1xf32>
    %cst_13 = arith.constant 9.99999974E-6 : f32
    %25 = vector.broadcast %cst_13 : f32 to vector<256x1xf32>
    %26 = arith.addf %24, %25 : vector<256x1xf32>
    %27 = math.rsqrt %26 : vector<256x1xf32>
    %28 = vector.broadcast %27 : vector<256x1xf32> to vector<256x128xf32>
    %29 = arith.mulf %15, %28 : vector<256x128xf32>
    %30 = vector.broadcast %8 : vector<1x128xf32> to vector<256x128xf32>
    %31 = arith.mulf %29, %30 : vector<256x128xf32>
    %32 = vector.broadcast %9 : vector<1x128xf32> to vector<256x128xf32>
    %33 = arith.addf %31, %32 : vector<256x128xf32>
    %c0_14 = arith.constant 0 : index
    %c0_15 = arith.constant 0 : index
    %34 = vector.load %arg4[%c0_14, %c0_15] : memref<128x128xf32, #tpu.memory_space<vmem>>, vector<128x128xf32>
    %cst_16 = arith.constant dense<0.000000e+00> : vector<256x128xf32>
    %35 = tpu.matmul %33, %34, %cst_16 {dimension_numbers = #tpu.dot_dimension_numbers<[1], [0], [0], [1], [0, 0, 1, 1], [], []>} : vector<256x128xf32>, vector<128x128xf32>, vector<256x128xf32> -> vector<256x128xf32>
    %c0_17 = arith.constant 0 : index
    %c0_18 = arith.constant 0 : index
    %36 = vector.load %arg5[%c0_17, %c0_18] : memref<3x128xf32, #tpu.memory_space<vmem>>, vector<1x128xf32>
    %37 = vector.broadcast %36 : vector<1x128xf32> to vector<256x128xf32>
    %38 = arith.addf %35, %37 : vector<256x128xf32>
    %cst_19 = arith.constant 0.000000e+00 : f32
    %39 = vector.broadcast %cst_19 : f32 to vector<256x128xf32>
    %40 = arith.maximumf %38, %39 : vector<256x128xf32>
    %c1_20 = arith.constant 1 : index
    %c0_21 = arith.constant 0 : index
    %41 = vector.load %arg5[%c1_20, %c0_21] : memref<3x128xf32, #tpu.memory_space<vmem>>, vector<1x128xf32>
    %c2_22 = arith.constant 2 : index
    %c0_23 = arith.constant 0 : index
    %42 = vector.load %arg5[%c2_22, %c0_23] : memref<3x128xf32, #tpu.memory_space<vmem>>, vector<1x128xf32>
    %cst_24 = arith.constant dense<0.000000e+00> : vector<256xf32>
    %43 = vector.multi_reduction <add>, %40, %cst_24 [1] : vector<256x128xf32> to vector<256xf32>
    %44 = vector.shape_cast %43 : vector<256xf32> to vector<256x1xf32>
    %cst_25 = arith.constant 0.020833334 : f32
    %45 = vector.broadcast %cst_25 : f32 to vector<256x1xf32>
    %46 = arith.mulf %44, %45 : vector<256x1xf32>
    %47 = vector.broadcast %46 : vector<256x1xf32> to vector<256x128xf32>
    %48 = arith.subf %40, %47 : vector<256x128xf32>
    %49 = arith.mulf %48, %48 : vector<256x128xf32>
    %cst_26 = arith.constant dense<0.000000e+00> : vector<256xf32>
    %50 = vector.multi_reduction <add>, %49, %cst_26 [1] : vector<256x128xf32> to vector<256xf32>
    %51 = vector.shape_cast %50 : vector<256xf32> to vector<256x1xf32>
    %52 = arith.mulf %46, %46 : vector<256x1xf32>
    %cst_27 = arith.constant 8.000000e+01 : f32
    %53 = vector.broadcast %cst_27 : f32 to vector<256x1xf32>
    %54 = arith.mulf %53, %52 : vector<256x1xf32>
    %55 = arith.subf %51, %54 : vector<256x1xf32>
    %cst_28 = arith.constant 0.020833334 : f32
    %56 = vector.broadcast %cst_28 : f32 to vector<256x1xf32>
    %57 = arith.mulf %55, %56 : vector<256x1xf32>
    %cst_29 = arith.constant 9.99999974E-6 : f32
    %58 = vector.broadcast %cst_29 : f32 to vector<256x1xf32>
    %59 = arith.addf %57, %58 : vector<256x1xf32>
    %60 = math.rsqrt %59 : vector<256x1xf32>
    %61 = vector.broadcast %60 : vector<256x1xf32> to vector<256x128xf32>
    %62 = arith.mulf %48, %61 : vector<256x128xf32>
    %63 = vector.broadcast %41 : vector<1x128xf32> to vector<256x128xf32>
    %64 = arith.mulf %62, %63 : vector<256x128xf32>
    %65 = vector.broadcast %42 : vector<1x128xf32> to vector<256x128xf32>
    %66 = arith.addf %64, %65 : vector<256x128xf32>
    %c0_30 = arith.constant 0 : index
    %c0_31 = arith.constant 0 : index
    %67 = vector.load %arg6[%c0_30, %c0_31] : memref<128x16xf32, #tpu.memory_space<vmem>>, vector<128x16xf32>
    %cst_32 = arith.constant dense<0.000000e+00> : vector<256x16xf32>
    %68 = tpu.matmul %66, %67, %cst_32 {dimension_numbers = #tpu.dot_dimension_numbers<[1], [0], [0], [1], [0, 0, 1, 1], [], []>} : vector<256x128xf32>, vector<128x16xf32>, vector<256x16xf32> -> vector<256x16xf32>
    %c0_33 = arith.constant 0 : index
    %c0_34 = arith.constant 0 : index
    %69 = vector.load %arg7[%c0_33, %c0_34] : memref<1x16xf32, #tpu.memory_space<vmem>>, vector<1x16xf32>
    %70 = vector.broadcast %69 : vector<1x16xf32> to vector<256x16xf32>
    %71 = arith.addf %68, %70 : vector<256x16xf32>
    %c0_35 = arith.constant 0 : index
    %c0_36 = arith.constant 0 : index
    %72 = vector.load %arg8[%c0_35, %c0_36] : memref<256x16xf32, #tpu.memory_space<vmem>>, vector<256x16xf32>
    tpu.vector_store %arg8[%c0_35, %c0_36], %71 {strides = array<i32>} : memref<256x16xf32, #tpu.memory_space<vmem>>, vector<256x16xf32>,
    return
  }
  func.func @transform_0(%arg0: i32) -> (i32, i32) {
    %c0_i32 = arith.constant 0 : i32
    %c0_i32_0 = arith.constant 0 : i32
    return %arg0, %c0_i32 : i32, i32
  }
  func.func @transform_1(%arg0: i32) -> (i32, i32) {
    %c0_i32 = arith.constant 0 : i32
    %c0_i32_0 = arith.constant 0 : i32
    %c0_i32_1 = arith.constant 0 : i32
    return %c0_i32, %c0_i32_0 : i32, i32
  }
  func.func @transform_2(%arg0: i32) -> (i32, i32) {
    %c0_i32 = arith.constant 0 : i32
    %c0_i32_0 = arith.constant 0 : i32
    %c0_i32_1 = arith.constant 0 : i32
    return %c0_i32, %c0_i32_0 : i32, i32
  }
  func.func @transform_3(%arg0: i32) -> (i32, i32) {
    %c0_i32 = arith.constant 0 : i32
    %c0_i32_0 = arith.constant 0 : i32
    %c0_i32_1 = arith.constant 0 : i32
    return %c0_i32, %c0_i32_0 : i32, i32
  }
  func.func @transform_4(%arg0: i32) -> (i32, i32) {
    %c0_i32 = arith.constant 0 : i32
    %c0_i32_0 = arith.constant 0 : i32
    %c0_i32_1 = arith.constant 0 : i32
    return %c0_i32, %c0_i32_0 : i32, i32
  }
  func.func @transform_5(%arg0: i32) -> (i32, i32) {
    %c0_i32 = arith.constant 0 : i32
    %c0_i32_0 = arith.constant 0 : i32
    %c0_i32_1 = arith.constant 0 : i32
    return %c0_i32, %c0_i32_0 : i32, i32
  }
  func.func @transform_6(%arg0: i32) -> (i32, i32) {
    %c0_i32 = arith.constant 0 : i32
    %c0_i32_0 = arith.constant 0 : i32
    %c0_i32_1 = arith.constant 0 : i32
    return %c0_i32, %c0_i32_0 : i32, i32
  }
  func.func @transform_7(%arg0: i32) -> (i32, i32) {
    %c0_i32 = arith.constant 0 : i32
    %c0_i32_0 = arith.constant 0 : i32
    return %arg0, %c0_i32 : i32, i32
  }
}

</mosaic_0001>

<bundles_post_ra>
// kernel: tpu_custom_call.1
= control target key start
LH: loop header
LB: loop body
LE: loop exit
PB: predicated region body
PF: predicated region fallthrough
CT: control target
= control target key end

     0   :  { %s2926_s24 = smov 0   ;;  %s4636_s0 = inlined_call_operand.vmem [shape: f32[512,32], index: 0, kind: input, shape index: {}]   ;;  %s4637_s1 = inlined_call_operand.vmem [shape: f32[32,128], index: 1, kind: input, shape index: {}]   ;;  %s4638_s2 = inlined_call_operand.vmem [shape: f32[3,128], index: 2, kind: input, shape index: {}]   ;;  %s4639_s3 = inlined_call_operand.vmem [shape: f32[128,128], index: 3, kind: input, shape index: {}]   ;;  %s4640_s4 = inlined_call_operand.vmem [shape: f32[3,128], index: 4, kind: input, shape index: {}]   ;;  %s4641_s5 = inlined_call_operand.vmem [shape: f32[128,16], index: 5, kind: input, shape index: {}]   ;;  %s4642_s6 = inlined_call_operand.vmem [shape: f32[1,16], index: 6, kind: input, shape index: {}]   ;;  %s4643_s7 = inlined_call_operand.vmem [shape: f32[512,16], index: 7, kind: output, shape index: {}]  }
   0x1 LB: > { %s2336_s25 = sadd.s32 4294967295, %s2884_s24   ;;  %p2340_p0 = scmp.ge.s32.totalorder %s2884_s24, 1  ;;  %s2884_s24 = sphi %s2926_s24, %s17_s24  }
   0x2   : > { %p238_p1 = scmp.lt.s32.totalorder %s2884_s24, 3 }
   0x4   : > { %p239_p2 = pnand %p2340_p0, %p238_p1 }
   0x6   : > { %242 = sbr.rel (%p239_p2) target bundleno = 1298 (0x512), region = 48 }
   0xb   : > { %v317_v0 = vld [vmem:[%s4637_s1 + $0x18] sm:$0xff]  ;;  %v316_v1 = vld [vmem:[%s4637_s1 + $0x10] sm:$0xff]  ;;  %s2341_s30 = sshll.u32 %s2336_s25, 5  ;;  %v315_v2 = vld [vmem:[%s4637_s1 + $0x8] sm:$0xff]  ;;  %vm323_vm0 = vcmask 261120   ;;  %vm2247_vm1 = vcmask 130048  }
   0xc   : > { %2518 = vmatprep.subr.mxu0 %v317_v0  ;;  %p271_p3 = scmp.lt.s32.totalorder %s2341_s30, 63  ;;  %2734 = vmatprep.subr.mxu1 %v317_v0  ;;  %v314_v3 = vld [vmem:[%s4637_s1] sm:$0xff] }
   0xd   : > { %2519 = vmatpush3.msra.mxu0 %v317_v0  ;;  %2738 = vmatpush3.msra.mxu1 %v317_v0  ;;  %v3023_v37 = vld [vmem:[%s4638_s2] ss:$0 sm:$0xff] }
   0xe   : > { %2520 = vmatprep.subr.mxu0 %v316_v1  ;;  %s4779_s30 = smov (!%p271_p3, %s2341_s30), 63  ;;  %2735 = vmatprep.subr.mxu1 %v316_v1 }
   0xf   : > { %2521 = vmatpush3.msra.mxu0 %v316_v1  ;;  %2739 = vmatpush3.msra.mxu1 %v316_v1  ;;  %s2342_s12 = sshll.u32 %s4779_s30, 3 }
  0x10   : > { %2522 = vmatprep.subr.mxu0 %v315_v2  ;;  %2736 = vmatprep.subr.mxu1 %v315_v2  ;;  %s2954_s15 = scalar_lea.vmem %s4636_s0, %s2342_s12  ;;  %s4535_s16 = scalar_lea.vmem %s4643_s7, %s2342_s12 }
  0x11   : > { %2523 = vmatpush3.msra.mxu0 %v315_v2  ;;  %2740 = vmatpush3.msra.mxu1 %v315_v2  ;;  %v282_v4 = vld [vmem:[%s2954_s15] sm:$0xff]  ;;  %v283_v5 = vld [vmem:[%s2954_s15 + $0x8] sm:$0xff]  ;;  %v284_v6 = vld [vmem:[%s2954_s15 + $0x10] sm:$0xff] }
  0x12   : > { %2524 = vmatprep.subr.mxu0 %v314_v3  ;;  %2737 = vmatprep.subr.mxu1 %v314_v3  ;;  %v285_v7 = vld [vmem:[%s2954_s15 + $0x18] sm:$0xff]  ;;  %v286_v8 = vld [vmem:[%s2954_s15 + $0x20] sm:$0xff]  ;;  %v299_v10 = vld [vmem:[%s2954_s15 + $0x88] sm:$0xff] }
  0x13   : > { %2525 = vmatpush3.msra.mxu0 %v314_v3  ;;  %2526 = vmatprep.mubr.msk.f32.mxu0 %vm323_vm0, %v282_v4  ;;  %v298_v9 = vld [vmem:[%s2954_s15 + $0x80] sm:$0xff]  ;;  %v300_v11 = vld [vmem:[%s2954_s15 + $0x90] sm:$0xff]  ;;  %v287_v12 = vld [vmem:[%s2954_s15 + $0x28] sm:$0xff] }
  0x14   : > { %2527 = vmatmul.mubr.msk.f32.vlgmr.msra.gmra.mxu0 %vm323_vm0, %v283_v5  ;;  %2741 = vmatpush3.msra.mxu1 %v314_v3  ;;  %v288_v13 = vld [vmem:[%s2954_s15 + $0x30] sm:$0xff]  ;;  %v301_v14 = vld [vmem:[%s2954_s15 + $0x98] sm:$0xff]  ;;  %v302_v15 = vld [vmem:[%s2954_s15 + $0xa0] sm:$0xff] }
  0x15   : > { %2529 = vmatprep.mubr.msk.f32.mxu0 %vm323_vm0, %v284_v6  ;;  %2550 = vmatprep.mubr.msk.f32.mxu1 %vm323_vm0, %v298_v9  ;;  %v289_v16 = vld [vmem:[%s2954_s15 + $0x38] sm:$0xff]  ;;  %v290_v17 = vld [vmem:[%s2954_s15 + $0x40] sm:$0xff]  ;;  %v303_v18 = vld [vmem:[%s2954_s15 + $0xa8] sm:$0xff] }
  0x16   : > { %2551 = vmatmul.mubr.msk.f32.vlgmr.msra.gmra.mxu1 %vm323_vm0, %v299_v10  ;;  %v304_v19 = vld [vmem:[%s2954_s15 + $0xb0] sm:$0xff]  ;;  %v291_v20 = vld [vmem:[%s2954_s15 + $0x48] sm:$0xff]  ;;  %v305_v22 = vld [vmem:[%s2954_s15 + $0xb8] sm:$0xff] }
  0x17   : > { %2553 = vmatprep.mubr.msk.f32.mxu1 %vm323_vm0, %v300_v11  ;;  %v292_v21 = vld [vmem:[%s2954_s15 + $0x50] sm:$0xff]  ;;  %v306_v23 = vld [vmem:[%s2954_s15 + $0xc0] sm:$0xff]  ;;  %v293_v24 = vld [vmem:[%s2954_s15 + $0x58] sm:$0xff] }
  0x18   : > { %2530 = vmatmul.mubr.msk.f32.gmra.mxu0 %vm323_vm0, %v285_v7  ;;  %v294_v25 = vld [vmem:[%s2954_s15 + $0x60] sm:$0xff]  ;;  %v307_v26 = vld [vmem:[%s2954_s15 + $0xc8] sm:$0xff]  ;;  %v308_v27 = vld [vmem:[%s2954_s15 + $0xd0] sm:$0xff] }
  0x19   : > { %2532 = vmatprep.mubr.msk.f32.mxu0 %vm323_vm0, %v286_v8  ;;  %v295_v28 = vld [vmem:[%s2954_s15 + $0x68] sm:$0xff]  ;;  %v296_v29 = vld [vmem:[%s2954_s15 + $0x70] sm:$0xff]  ;;  %v309_v30 = vld [vmem:[%s2954_s15 + $0xd8] sm:$0xff] }
  0x1a   : > { %2554 = vmatmul.mubr.msk.f32.gmra.mxu1 %vm323_vm0, %v301_v14  ;;  %v310_v31 = vld [vmem:[%s2954_s15 + $0xe0] sm:$0xff]  ;;  %v297_v32 = vld [vmem:[%s2954_s15 + $0x78] sm:$0xff]  ;;  %v311_v33 = vld [vmem:[%s2954_s15 + $0xe8] sm:$0xff] }
  0x1b   : > { %2556 = vmatprep.mubr.msk.f32.mxu1 %vm323_vm0, %v302_v15  ;;  %v312_v34 = vld [vmem:[%s2954_s15 + $0xf0] sm:$0xff]  ;;  %v313_v35 = vld [vmem:[%s2954_s15 + $0xf8] sm:$0xff] }
  0x1c   : > { %2533 = vmatmul.mubr.msk.f32.gmra.mxu0 %vm323_vm0, %v287_v12 }
  0x1d   : > { %2535 = vmatprep.mubr.msk.f32.mxu0 %vm323_vm0, %v288_v13 }
  0x1e   : > { %2557 = vmatmul.mubr.msk.f32.gmra.mxu1 %vm323_vm0, %v303_v18 }
  0x1f   : > { %2559 = vmatprep.mubr.msk.f32.mxu1 %vm323_vm0, %v304_v19 }
  0x20   : > { %2536 = vmatmul.mubr.msk.f32.gmra.mxu0 %vm323_vm0, %v289_v16 }
  0x21   : > { %2538 = vmatprep.mubr.msk.f32.mxu0 %vm323_vm0, %v290_v17 }
  0x22   : > { %2560 = vmatmul.mubr.msk.f32.gmra.mxu1 %vm323_vm0, %v305_v22 }
  0x23   : > { %2562 = vmatprep.mubr.msk.f32.mxu1 %vm323_vm0, %v306_v23 }
  0x24   : > { %2539 = vmatmul.mubr.msk.f32.gmra.mxu0 %vm323_vm0, %v291_v20 }
  0x25   : > { %2541 = vmatprep.mubr.msk.f32.mxu0 %vm323_vm0, %v292_v21 }
  0x26   : > { %2563 = vmatmul.mubr.msk.f32.gmra.mxu1 %vm323_vm0, %v307_v26 }
  0x27   : > { %2565 = vmatprep.mubr.msk.f32.mxu1 %vm323_vm0, %v308_v27 }
  0x28   : > { %2542 = vmatmul.mubr.msk.f32.gmra.mxu0 %vm323_vm0, %v293_v24 }
  0x29   : > { %2544 = vmatprep.mubr.msk.f32.mxu0 %vm323_vm0, %v294_v25 }
  0x2a   : > { %2566 = vmatmul.mubr.msk.f32.gmra.mxu1 %vm323_vm0, %v309_v30 }
  0x2b   : > { %2568 = vmatprep.mubr.msk.f32.mxu1 %vm323_vm0, %v310_v31 }
  0x2c   : > { %2545 = vmatmul.mubr.msk.f32.gmra.mxu0 %vm323_vm0, %v295_v28 }
  0x2d   : > { %2547 = vmatprep.mubr.msk.f32.mxu0 %vm323_vm0, %v296_v29 }
  0x2e   : > { %2569 = vmatmul.mubr.msk.f32.gmra.mxu1 %vm323_vm0, %v311_v33 }
  0x2f   : > { %2571 = vmatprep.mubr.msk.f32.mxu1 %vm323_vm0, %v312_v34 }
  0x30   : > { %2548 = vmatmul.mubr.msk.f32.gmra.mxu0 %vm323_vm0, %v297_v32 }
  0x32   : > { %2572 = vmatmul.mubr.msk.f32.gmra.mxu1 %vm323_vm0, %v313_v35 }
  0xd4   : > { %v2528_v36 = vpop.f32.mrf.mxu0 }
  0xd5   : > { %v3029_v41 = vadd.f32 %v2528_v36, %v3023_v37 }
  0xd6   : > { %v486_v38 = vpop.f32.mrf.mxu0  ;;  %v3032_v43 = vpop.f32.mrf.mxu1 }
  0xd7   : > { %v3026_v39 = vadd.f32 %v3023_v37, %v486_v38  ;;  %v646_v48 = vmax.f32 %v3029_v41, 0.0  ;;  %v3134_v35 = vadd.f32 %v3032_v43, %v3023_v37 }
  0xd8   : > { %v2531_v40 = vpop.f32.mrf.mxu0  ;;  %v566_v46 = vpop.f32.mrf.mxu1 }
  0xd9   : > { %v645_v42 = vmax.f32 %v3026_v39, 0.0  ;;  %v3041_v49 = vadd.f32 %v2531_v40, %v3023_v37  ;;  %v3116_v26 = vadd.f32 %v3023_v37, %v566_v46 }
  0xda   : > { %v496_v44 = vpop.f32.mrf.mxu0  ;;  %v3044_v51 = vpop.f32.mrf.mxu1 }
  0xdb   : > { %v3035_v45 = vadd.f32 %v3023_v37, %v496_v44  ;;  %679 = vadd.xlane.f32.xlu0 %v645_v42  ;;  %v648_v56 = vmax.f32 %v3041_v49, 0.0  ;;  %v661_v31 = vmax.f32 %v3116_v26, 0.0  ;;  %v662_v44 = vmax.f32 %v3134_v35, 0.0  ;;  %v1204_v26 = vld [vmem:[%s4639_s3 + $0x28] sm:$0xff] }
  0xdc   : > { %v2534_v47 = vpop.f32.mrf.mxu0  ;;  %v576_v54 = vpop.f32.mrf.mxu1  ;;  %v3147_v46 = vadd.f32 %v3044_v51, %v3023_v37 }
  0xdd   : > { %v647_v50 = vmax.f32 %v3035_v45, 0.0  ;;  %v3055_v57 = vadd.f32 %v2534_v47, %v3023_v37  ;;  %v3129_v32 = vadd.f32 %v3023_v37, %v576_v54 }
  0xde   : > { %v506_v52 = vpop.f32.mrf.mxu0  ;;  %v3058_v59 = vpop.f32.mrf.mxu1  ;;  %v664_v54 = vmax.f32 %v3147_v46, 0.0 }
  0xdf   : > { %v3047_v53 = vadd.f32 %v3023_v37, %v506_v52  ;;  %683 = vadd.xlane.f32.xlu1 %v647_v50  ;;  %681 = vadd.xlane.f32.xlu0 %v646_v48  ;;  %v650_v0 = vmax.f32 %v3055_v57, 0.0  ;;  %v663_v36 = vmax.f32 %v3129_v32, 0.0  ;;  %v1212_v57 = vld [vmem:[%s4639_s3 + $0x68] sm:$0xff]  ;;  %v1203_v32 = vld [vmem:[%s4639_s3 + $0x20] sm:$0xff] }
  0xe0   : > { %v2537_v55 = vpop.f32.mrf.mxu0  ;;  %v586_v63 = vpop.f32.mrf.mxu1 }
  0xe1   : > { %v649_v58 = vmax.f32 %v3047_v53, 0.0  ;;  %v3069_v1 = vadd.f32 %v2537_v55, %v3023_v37  ;;  %v3142_v38 = vadd.f32 %v3023_v37, %v586_v63  ;;  %v3160_v55 = vadd.f32 %v3058_v59, %v3023_v37 }
  0xe2   : > { %v516_v60 = vpop.f32.mrf.mxu0  ;;  %v2561_v6 = vpop.f32.mrf.mxu1 }
  0xe3   : > { %v3061_v61 = vadd.f32 %v3023_v37, %v516_v60  ;;  %685 = vadd.xlane.f32.xlu1 %v648_v56  ;;  %687 = vadd.xlane.f32.xlu0 %v649_v58  ;;  %v652_v7 = vmax.f32 %v3069_v1, 0.0  ;;  %v4655_v43 = vmax.f32 %v3142_v38, 0.0  ;;  %v4654_v63 = vmax.f32 %v3160_v55, 0.0 }
  0xe4   : > { %v2540_v62 = vpop.f32.mrf.mxu0  ;;  %v596_v13 = vpop.f32.mrf.mxu1 }
  0xe5   : > { %v651_v2 = vmax.f32 %v3061_v61, 0.0  ;;  %v3081_v8 = vadd.f32 %v2540_v62, %v3023_v37  ;;  %v3155_v47 = vadd.f32 %v3023_v37, %v596_v13 }
  0xe6   : > { %v526_v3 = vpop.f32.mrf.mxu0  ;;  %v2564_v20 = vpop.f32.mrf.mxu1 }
  0xe7   : > { %v3073_v4 = vadd.f32 %v3023_v37, %v526_v3  ;;  %689 = vadd.xlane.f32.xlu1 %v650_v0  ;;  %691 = vadd.xlane.f32.xlu0 %v651_v2  ;;  %v654_v14 = vmax.f32 %v3081_v8, 0.0  ;;  %v4653_v51 = vmax.f32 %v3155_v47, 0.0  ;;  %v3172_v3 = vadd.f32 %v2561_v6, %v3023_v37 }
  0xe8   : > { %v2543_v5 = vpop.f32.mrf.mxu0  ;;  %v606_v27 = vpop.f32.mrf.mxu1  ;;  %v3184_v13 = vadd.f32 %v2564_v20, %v3023_v37 }
  0xe9   : > { %v653_v9 = vmax.f32 %v3073_v4, 0.0  ;;  %v3093_v15 = vadd.f32 %v2543_v5, %v3023_v37  ;;  %v3168_v60 = vadd.f32 %v3023_v37, %v606_v27 }
  0xea   : > { %v536_v10 = vpop.f32.mrf.mxu0  ;;  %v2567_v33 = vpop.f32.mrf.mxu1 }
  0xeb   : > { %v3085_v11 = vadd.f32 %v3023_v37, %v536_v10  ;;  %693 = vadd.xlane.f32.xlu1 %v652_v7  ;;  %695 = vadd.xlane.f32.xlu0 %v653_v9  ;;  %v656_v21 = vmax.f32 %v3093_v15, 0.0  ;;  %v4644_v59 = vmax.f32 %v3168_v60, 0.0  ;;  %v3196_v27 = vadd.f32 %v2567_v33, %v3023_v37 }
  0xec   : > { %v2546_v12 = vpop.f32.mrf.mxu0  ;;  %v616_v40 = vpop.f32.mrf.mxu1 }
  0xed   : > { %v655_v16 = vmax.f32 %v3085_v11, 0.0  ;;  %v3105_v22 = vadd.f32 %v2546_v12, %v3023_v37  ;;  %v3180_v5 = vadd.f32 %v3023_v37, %v616_v40  ;;  %v4645_v12 = vmax.f32 %v3172_v3, 0.0  ;;  %v1209_v11 = vld [vmem:[%s4639_s3 + $0x50] sm:$0xff] }
  0xee   : > { %v546_v17 = vpop.f32.mrf.mxu0  ;;  %v2570_v52 = vpop.f32.mrf.mxu1 }
  0xef   : > { %v3097_v18 = vadd.f32 %v3023_v37, %v546_v17  ;;  %697 = vadd.xlane.f32.xlu1 %v654_v14  ;;  %699 = vadd.xlane.f32.xlu0 %v655_v16  ;;  %v658_v28 = vmax.f32 %v3105_v22, 0.0  ;;  %v4646_v6 = vmax.f32 %v3180_v5, 0.0 }
  0xf0   : > { %v2549_v19 = vpop.f32.mrf.mxu0  ;;  %v626_v62 = vpop.f32.mrf.mxu1 }
  0xf1   : > { %v657_v23 = vmax.f32 %v3097_v18, 0.0  ;;  %v3120_v29 = vadd.f32 %v2549_v19, %v3023_v37  ;;  %v3192_v17 = vadd.f32 %v3023_v37, %v626_v62  ;;  %v4651_v62 = vmax.f32 %v3196_v27, 0.0  ;;  %v1207_v18 = vld [vmem:[%s4639_s3 + $0x40] sm:$0xff] }
  0xf2   : > { %v556_v24 = vpop.f32.mrf.mxu0  ;;  %v2573_v10 = vpop.f32.mrf.mxu1 }
  0xf3   : > { %v3109_v25 = vadd.f32 %v3023_v37, %v556_v24  ;;  %701 = vadd.xlane.f32.xlu1 %v656_v21  ;;  %703 = vadd.xlane.f32.xlu0 %v657_v23  ;;  %v660_v34 = vmax.f32 %v3120_v29, 0.0  ;;  %v4652_v24 = vmax.f32 %v3184_v13, 0.0  ;;  %v4650_v20 = vmax.f32 %v3192_v17, 0.0 }
  0xf4   : > { %v636_v19 = vpop.f32.mrf.mxu1 }
  0xf5   : > { %v659_v30 = vmax.f32 %v3109_v25, 0.0  ;;  %v3204_v40 = vadd.f32 %v3023_v37, %v636_v19  ;;  %v1214_v19 = vld [vmem:[%s4639_s3 + $0x78] sm:$0xff] }
  0xf6   : > { %2574 = vmatprep.subr.mxu1 %v1214_v19  ;;  %v1206_v25 = vld [vmem:[%s4639_s3 + $0x38] sm:$0xff] }
  0xf7   : > { %705 = vadd.xlane.f32.xlu1 %v658_v28  ;;  %707 = vadd.xlane.f32.xlu0 %v659_v30 }
  0xf8   : > { %2575 = vmatpush3.msra.mxu1 %v1214_v19 }
  0xfb   : > { %709 = vadd.xlane.f32.xlu1 %v660_v34  ;;  %711 = vadd.xlane.f32.xlu0 %v661_v31 }
  0xff   : > { %713 = vadd.xlane.f32.xlu1 %v662_v44  ;;  %715 = vadd.xlane.f32.xlu0 %v663_v36 }
 0x103   : > { %717 = vadd.xlane.f32.xlu1 %v664_v54  ;;  %719 = vadd.xlane.f32.xlu0 %v4655_v43 }
 0x107   : > { %721 = vadd.xlane.f32.xlu1 %v4654_v63  ;;  %723 = vadd.xlane.f32.xlu0 %v4653_v51 }
 0x10b   : > { %725 = vadd.xlane.f32.xlu1 %v4645_v12  ;;  %727 = vadd.xlane.f32.xlu0 %v4644_v59  ;;  %v3208_v59 = vadd.f32 %v2570_v52, %v3023_v37  ;;  %v4648_v12 = vmax.f32 %v3204_v40, 0.0 }
 0x10d   : > { %v4647_v33 = vmax.f32 %v3208_v59, 0.0 }
 0x10f   : > { %729 = vadd.xlane.f32.xlu1 %v4652_v24  ;;  %731 = vadd.xlane.f32.xlu0 %v4646_v6  ;;  %v3217_v6 = vadd.f32 %v2573_v10, %v3023_v37  ;;  %v1213_v37 = vld [vmem:[%s4639_s3 + $0x70] sm:$0xff] }
 0x110   : > { %2576 = vmatprep.subr.mxu1 %v1213_v37 }
 0x111   : > { %v4649_v52 = vmax.f32 %v3217_v6, 0.0  ;;  %2577 = vmatpush3.msra.mxu1 %v1213_v37 }
 0x112   : > { %2578 = vmatprep.subr.mxu1 %v1212_v57 }
 0x113   : > { %733 = vadd.xlane.f32.xlu1 %v4651_v62  ;;  %735 = vadd.xlane.f32.xlu0 %v4650_v20 }
 0x114   : > { %2579 = vmatpush3.msra.mxu1 %v1212_v57 }
 0x117   : > { %737 = vadd.xlane.f32.xlu1 %v4647_v33  ;;  %739 = vadd.xlane.f32.xlu0 %v4648_v12 }
 0x11b   : > { %741 = vadd.xlane.f32.xlu1 %v4649_v52 }
 0x164   : > { %v680_v10 = vpop.xlane.xlu0 %679 }
 0x165   : > { %v3232_v33 = vmul.f32 0.015625, %v680_v10 }
 0x167   : > { %v3237_v12 = vsub.f32 %v645_v42, %v3232_v33 }
 0x168   : > { %v684_v52 = vpop.xlane.xlu1 %683  ;;  %v682_v20 = vpop.xlane.xlu0 %681 }
 0x169   : > { %v3239_v62 = vmul.f32 0.015625, %v684_v52  ;;  %v3241_v24 = vmul.f32 0.015625, %v682_v20  ;;  %v807_v51 = vmul.f32 %v3237_v12, %v3237_v12 }
 0x16b   : > { %839 = vadd.xlane.f32.xlu0 %v807_v51  ;;  %v3248_v19 = vsub.f32 %v647_v50, %v3239_v62  ;;  %v3253_v39 = vsub.f32 %v646_v48, %v3241_v24 }
 0x16c   : > { %v686_v42 = vpop.xlane.xlu1 %685  ;;  %v688_v37 = vpop.xlane.xlu0 %687 }
 0x16d   : > { %v3255_v52 = vmul.f32 0.015625, %v686_v42  ;;  %v3257_v20 = vmul.f32 0.015625, %v688_v37  ;;  %v809_v10 = vmul.f32 %v3248_v19, %v3248_v19  ;;  %v808_v51 = vmul.f32 %v3253_v39, %v3253_v39 }
 0x16f   : > { %843 = vadd.xlane.f32.xlu0 %v809_v10  ;;  %841 = vadd.xlane.f32.xlu1 %v808_v51  ;;  %v3266_v41 = vsub.f32 %v648_v56, %v3255_v52  ;;  %v3271_v45 = vsub.f32 %v649_v58, %v3257_v20 }
 0x170   : > { %v690_v48 = vpop.xlane.xlu1 %689  ;;  %v692_v50 = vpop.xlane.xlu0 %691 }
 0x171   : > { %v3273_v42 = vmul.f32 0.015625, %v690_v48  ;;  %v3275_v37 = vmul.f32 0.015625, %v692_v50  ;;  %v810_v10 = vmul.f32 %v3266_v41, %v3266_v41  ;;  %v811_v51 = vmul.f32 %v3271_v45, %v3271_v45 }
 0x173   : > { %845 = vadd.xlane.f32.xlu1 %v810_v10  ;;  %847 = vadd.xlane.f32.xlu0 %v811_v51  ;;  %v3284_v49 = vsub.f32 %v650_v0, %v3273_v42  ;;  %v3289_v53 = vsub.f32 %v651_v2, %v3275_v37 }
 0x174   : > { %v694_v56 = vpop.xlane.xlu1 %693  ;;  %v696_v58 = vpop.xlane.xlu0 %695 }
 0x175   : > { %v3291_v48 = vmul.f32 0.015625, %v694_v56  ;;  %v3293_v50 = vmul.f32 0.015625, %v696_v58  ;;  %v812_v10 = vmul.f32 %v3284_v49, %v3284_v49  ;;  %v813_v51 = vmul.f32 %v3289_v53, %v3289_v53  ;;  %v1211_v58 = vld [vmem:[%s4639_s3 + $0x60] sm:$0xff] }
 0x176   : > { %2580 = vmatprep.subr.mxu1 %v1211_v58 }
 0x177   : > { %849 = vadd.xlane.f32.xlu1 %v812_v10  ;;  %851 = vadd.xlane.f32.xlu0 %v813_v51  ;;  %v3305_v61 = vsub.f32 %v652_v7, %v3291_v48  ;;  %v3310_v0 = vsub.f32 %v653_v9, %v3293_v50  ;;  %v1210_v51 = vld [vmem:[%s4639_s3 + $0x58] sm:$0xff] }
 0x178   : > { %v698_v2 = vpop.xlane.xlu1 %697  ;;  %v700_v56 = vpop.xlane.xlu0 %699  ;;  %2581 = vmatpush3.msra.mxu1 %v1211_v58 }
 0x179   : > { %v3315_v63 = vmul.f32 0.015625, %v698_v2  ;;  %v3317_v10 = vmul.f32 0.015625, %v700_v56  ;;  %v814_v1 = vmul.f32 %v3305_v61, %v3305_v61  ;;  %v815_v7 = vmul.f32 %v3310_v0, %v3310_v0  ;;  %2582 = vmatprep.subr.mxu1 %v1210_v51 }
 0x17a   : > { %2583 = vmatpush3.msra.mxu1 %v1210_v51 }
 0x17b   : > { %853 = vadd.xlane.f32.xlu1 %v814_v1  ;;  %855 = vadd.xlane.f32.xlu0 %v815_v7  ;;  %v3326_v4 = vsub.f32 %v654_v14, %v3315_v63  ;;  %v3331_v9 = vsub.f32 %v655_v16, %v3317_v10  ;;  %v1208_v7 = vld [vmem:[%s4639_s3 + $0x48] sm:$0xff] }
 0x17c   : > { %v702_v2 = vpop.xlane.xlu1 %701  ;;  %v704_v56 = vpop.xlane.xlu0 %703  ;;  %2584 = vmatprep.subr.mxu1 %v1209_v11 }
 0x17d   : > { %v3336_v57 = vmul.f32 0.015625, %v702_v2  ;;  %v3338_v1 = vmul.f32 0.015625, %v704_v56  ;;  %v816_v8 = vmul.f32 %v3326_v4, %v3326_v4  ;;  %v817_v14 = vmul.f32 %v3331_v9, %v3331_v9  ;;  %2585 = vmatpush3.msra.mxu1 %v1209_v11 }
 0x17e   : > { %2586 = vmatprep.subr.mxu1 %v1208_v7 }
 0x17f   : > { %857 = vadd.xlane.f32.xlu1 %v816_v8  ;;  %859 = vadd.xlane.f32.xlu0 %v817_v14  ;;  %v3350_v16 = vsub.f32 %v656_v21, %v3336_v57  ;;  %v3355_v58 = vsub.f32 %v657_v23, %v3338_v1 }
 0x180   : > { %v706_v2 = vpop.xlane.xlu1 %705  ;;  %v708_v56 = vpop.xlane.xlu0 %707  ;;  %2587 = vmatpush3.msra.mxu1 %v1208_v7  ;;  %v1205_v7 = vld [vmem:[%s4639_s3 + $0x30] sm:$0xff] }
 0x181   : > { %v3360_v51 = vmul.f32 0.015625, %v706_v2  ;;  %v3362_v8 = vmul.f32 0.015625, %v708_v56  ;;  %v818_v15 = vmul.f32 %v3350_v16, %v3350_v16  ;;  %v819_v21 = vmul.f32 %v3355_v58, %v3355_v58  ;;  %2588 = vmatprep.subr.mxu1 %v1207_v18 }
 0x182   : > { %2589 = vmatpush3.msra.mxu1 %v1207_v18 }
 0x183   : > { %861 = vadd.xlane.f32.xlu1 %v818_v15  ;;  %863 = vadd.xlane.f32.xlu0 %v819_v21  ;;  %v3374_v23 = vsub.f32 %v658_v28, %v3360_v51  ;;  %v3379_v14 = vsub.f32 %v659_v30, %v3362_v8 }
 0x184   : > { %v710_v2 = vpop.xlane.xlu1 %709  ;;  %v712_v56 = vpop.xlane.xlu0 %711  ;;  %2590 = vmatprep.subr.mxu1 %v1206_v25 }
 0x185   : > { %v3381_v11 = vmul.f32 0.015625, %v710_v2  ;;  %v3383_v43 = vmul.f32 0.015625, %v712_v56  ;;  %v820_v15 = vmul.f32 %v3374_v23, %v3374_v23  ;;  %v821_v22 = vmul.f32 %v3379_v14, %v3379_v14  ;;  %2591 = vmatpush3.msra.mxu1 %v1206_v25 }
 0x186   : > { %2592 = vmatprep.subr.mxu1 %v1205_v7 }
 0x187   : > { %865 = vadd.xlane.f32.xlu1 %v820_v15  ;;  %867 = vadd.xlane.f32.xlu0 %v821_v22  ;;  %v3395_v28 = vsub.f32 %v660_v34, %v3381_v11  ;;  %v3400_v30 = vsub.f32 %v661_v31, %v3383_v43 }
 0x188   : > { %v714_v21 = vpop.xlane.xlu1 %713  ;;  %v716_v2 = vpop.xlane.xlu0 %715  ;;  %2593 = vmatpush3.msra.mxu1 %v1205_v7 }
 0x189   : > { %v3405_v18 = vmul.f32 0.015625, %v714_v21  ;;  %v3407_v56 = vmul.f32 0.015625, %v716_v2  ;;  %v822_v29 = vmul.f32 %v3395_v28, %v3395_v28  ;;  %v823_v34 = vmul.f32 %v3400_v30, %v3400_v30  ;;  %2594 = vmatprep.subr.mxu1 %v1204_v26 }
 0x18a   : > { %2595 = vmatpush3.msra.mxu1 %v1204_v26 }
 0x18b   : > { %869 = vadd.xlane.f32.xlu1 %v822_v29  ;;  %871 = vadd.xlane.f32.xlu0 %v823_v34  ;;  %v3419_v31 = vsub.f32 %v662_v44, %v3405_v18  ;;  %v3424_v15 = vsub.f32 %v663_v36, %v3407_v56  ;;  %v4698_v44 = vmax.f32 %v3142_v38, 0.0  ;;  %v1202_v34 = vld [vmem:[%s4639_s3 + $0x18] sm:$0xff]  ;;  %v1201_v38 = vld [vmem:[%s4639_s3 + $0x10] sm:$0xff] }
 0x18c   : > { %v718_v22 = vpop.xlane.xlu1 %717  ;;  %v720_v21 = vpop.xlane.xlu0 %719  ;;  %2596 = vmatprep.subr.mxu1 %v1203_v32 }
 0x18d   : > { %4696 = vst [vmem:[#allocation2_spill] sm:$0xff] %v3424_v15  ;;  %v3426_v25 = vmul.f32 0.015625, %v718_v22  ;;  %v3428_v2 = vmul.f32 0.015625, %v720_v21  ;;  %v824_v29 = vmul.f32 %v3419_v31, %v3419_v31  ;;  %v825_v35 = vmul.f32 %v3424_v15, %v3424_v15  ;;  %2597 = vmatpush3.msra.mxu1 %v1203_v32 }
 0x18e   : > { %2598 = vmatprep.subr.mxu1 %v1202_v34 }
 0x18f   : > { %873 = vadd.xlane.f32.xlu1 %v824_v29  ;;  %875 = vadd.xlane.f32.xlu0 %v825_v35  ;;  %v3440_v36 = vsub.f32 %v664_v54, %v3426_v25  ;;  %v3445_v7 = vsub.f32 %v4698_v44, %v3428_v2  ;;  %v4700_v35 = vmax.f32 %v3160_v55, 0.0 }
 0x190   : > { %v722_v22 = vpop.xlane.xlu1 %721  ;;  %v724_v21 = vpop.xlane.xlu0 %723  ;;  %2599 = vmatpush3.msra.mxu1 %v1202_v34 }
 0x191   : > { %4697 = vst [vmem:[#allocation3_spill] sm:$0xff] %v3440_v36  ;;  %4699 = vst [vmem:[#allocation4_spill] sm:$0xff] %v3445_v7  ;;  %v3450_v26 = vmul.f32 0.015625, %v722_v22  ;;  %v3452_v29 = vmul.f32 0.015625, %v724_v21  ;;  %v826_v46 = vmul.f32 %v3440_v36, %v3440_v36  ;;  %v827_v54 = vmul.f32 %v3445_v7, %v3445_v7  ;;  %2600 = vmatprep.subr.mxu1 %v1201_v38 }
 0x192   : > { %v4702_v22 = vmax.f32 %v3155_v47, 0.0  ;;  %v1200_v47 = vld [vmem:[%s4639_s3 + $0x8] sm:$0xff]  ;;  %2601 = vmatpush3.msra.mxu1 %v1201_v38 }
 0x193   : > { %877 = vadd.xlane.f32.xlu1 %v826_v46  ;;  %879 = vadd.xlane.f32.xlu0 %v827_v54  ;;  %v3464_v44 = vsub.f32 %v4700_v35, %v3450_v26  ;;  %v1199_v35 = vld [vmem:[%s4639_s3] sm:$0xff] }
 0x194   : > { %v3469_v21 = vsub.f32 %v4702_v22, %v3452_v29  ;;  %v726_v36 = vpop.xlane.xlu1 %725  ;;  %v728_v7 = vpop.xlane.xlu0 %727  ;;  %2602 = vmatprep.subr.mxu1 %v1200_v47 }
 0x195   : > { %4701 = vst [vmem:[#allocation5_spill] sm:$0xff] %v3464_v44  ;;  %v3471_v32 = vmul.f32 0.015625, %v726_v36  ;;  %v3473_v15 = vmul.f32 0.015625, %v728_v7  ;;  %v828_v46 = vmul.f32 %v3464_v44, %v3464_v44  ;;  %v4704_v36 = vmax.f32 %v3172_v3, 0.0  ;;  %2603 = vmatpush3.msra.mxu1 %v1200_v47 }
 0x196   : > { %4703 = vst [vmem:[#allocation6_spill] sm:$0xff] %v3469_v21  ;;  %v829_v55 = vmul.f32 %v3469_v21, %v3469_v21  ;;  %v4706_v7 = vmax.f32 %v3168_v60, 0.0  ;;  %2604 = vmatprep.subr.mxu1 %v1199_v35  ;;  %v4708_v60 = vmax.f32 %v3184_v13, 0.0 }
 0x197   : > { %881 = vadd.xlane.f32.xlu1 %v828_v46  ;;  %v3485_v34 = vsub.f32 %v4704_v36, %v3471_v32  ;;  %2605 = vmatpush3.msra.mxu1 %v1199_v35  ;;  %v4714_v35 = vmax.f32 %v3192_v17, 0.0  ;;  %v4718_v17 = vmax.f32 %v3208_v59, 0.0 }
 0x198   : > { %883 = vadd.xlane.f32.xlu0 %v829_v55  ;;  %v3490_v54 = vsub.f32 %v4706_v7, %v3473_v15  ;;  %v730_v22 = vpop.xlane.xlu1 %729  ;;  %v732_v21 = vpop.xlane.xlu0 %731  ;;  %v4710_v7 = vmax.f32 %v3180_v5, 0.0  ;;  %v4712_v5 = vmax.f32 %v3196_v27, 0.0  ;;  %v4716_v27 = vmax.f32 %v3204_v40, 0.0 }
 0x199   : > { %4705 = vst [vmem:[#allocation7_spill] sm:$0xff] %v3485_v34  ;;  %v3495_v38 = vmul.f32 0.015625, %v730_v22  ;;  %v3497_v46 = vmul.f32 0.015625, %v732_v21  ;;  %v830_v3 = vmul.f32 %v3485_v34, %v3485_v34  ;;  %v4721_v40 = vmax.f32 %v3217_v6, 0.0 }
 0x19a   : > { %4707 = vst [vmem:[#allocation8_spill] sm:$0xff] %v3490_v54  ;;  %v831_v55 = vmul.f32 %v3490_v54, %v3490_v54 }
 0x19b   : > { %885 = vadd.xlane.f32.xlu1 %v830_v3  ;;  %v3506_v36 = vsub.f32 %v4708_v60, %v3495_v38  ;;  %v3511_v21 = vsub.f32 %v4710_v7, %v3497_v46 }
 0x19c   : > { %887 = vadd.xlane.f32.xlu0 %v831_v55  ;;  %v734_v22 = vpop.xlane.xlu1 %733  ;;  %v736_v44 = vpop.xlane.xlu0 %735 }
 0x19d   : > { %4709 = vst [vmem:[#allocation9_spill] sm:$0xff] %v3506_v36  ;;  %4711 = vst [vmem:[#allocation10_spill] sm:$0xff] %v3511_v21  ;;  %v3513_v34 = vmul.f32 0.015625, %v734_v22  ;;  %v3515_v54 = vmul.f32 0.015625, %v736_v44  ;;  %v832_v47 = vmul.f32 %v3506_v36, %v3506_v36  ;;  %v833_v13 = vmul.f32 %v3511_v21, %v3511_v21 }
 0x19f   : > { %889 = vadd.xlane.f32.xlu1 %v832_v47  ;;  %v3524_v3 = vsub.f32 %v4712_v5, %v3513_v34  ;;  %v3529_v55 = vsub.f32 %v4714_v35, %v3515_v54 }
 0x1a0   : > { %891 = vadd.xlane.f32.xlu0 %v833_v13  ;;  %v738_v44 = vpop.xlane.xlu1 %737  ;;  %v740_v60 = vpop.xlane.xlu0 %739 }
 0x1a1   : > { %4713 = vst [vmem:[#allocation11_spill] sm:$0xff] %v3524_v3  ;;  %4715 = vst [vmem:[#allocation12_spill] sm:$0xff] %v3529_v55  ;;  %v3531_v7 = vmul.f32 0.015625, %v738_v44  ;;  %v3533_v22 = vmul.f32 0.015625, %v740_v60  ;;  %v834_v47 = vmul.f32 %v3524_v3, %v3524_v3  ;;  %v835_v13 = vmul.f32 %v3529_v55, %v3529_v55 }
 0x1a3   : > { %v3542_v5 = vsub.f32 %v4716_v27, %v3533_v22  ;;  %893 = vadd.xlane.f32.xlu1 %v834_v47  ;;  %v3547_v35 = vsub.f32 %v4718_v17, %v3531_v7  ;;  %v903_v47 = vmul.f32 %v3232_v33, %v3232_v33  ;;  %v904_v17 = vmul.f32 %v3241_v24, %v3241_v24 }
 0x1a4   : > { %895 = vadd.xlane.f32.xlu0 %v835_v13  ;;  %v742_v44 = vpop.xlane.xlu1 %741 }
 0x1a5   : > { %4717 = vst [vmem:[#allocation13_spill] sm:$0xff] %v3542_v5  ;;  %4719 = vst [vmem:[#allocation14_spill] sm:$0xff] %v3547_v35  ;;  %v3549_v60 = vmul.f32 0.015625, %v742_v44  ;;  %v836_v3 = vmul.f32 %v3547_v35, %v3547_v35  ;;  %v837_v55 = vmul.f32 %v3542_v5, %v3542_v5  ;;  %v935_v13 = vmul.f32 64.0, %v903_v47 }
 0x1a6   : > { %v905_v44 = vmul.f32 %v3239_v62, %v3239_v62  ;;  %v908_v47 = vmul.f32 %v3273_v42, %v3273_v42  ;;  %v911_v42 = vmul.f32 %v3293_v50, %v3293_v50 }
 0x1a7   : > { %4720 = vst [vmem:[#allocation15_spill] sm:$0xff] %v3549_v60  ;;  %v3558_v27 = vsub.f32 %v4721_v40, %v3549_v60  ;;  %897 = vadd.xlane.f32.xlu1 %v836_v3  ;;  %v906_v3 = vmul.f32 %v3255_v52, %v3255_v52  ;;  %v936_v40 = vmul.f32 64.0, %v904_v17  ;;  %v910_v52 = vmul.f32 %v3291_v48, %v3291_v48 }
 0x1a8   : > { %899 = vadd.xlane.f32.xlu0 %v837_v55  ;;  %v937_v35 = vmul.f32 64.0, %v905_v44  ;;  %v940_v60 = vmul.f32 64.0, %v908_v47  ;;  %v913_v48 = vmul.f32 %v3317_v10, %v3317_v10 }
 0x1a9   : > { %4722 = vst [vmem:[#allocation16_spill] sm:$0xff] %v3558_v27  ;;  %v838_v59 = vmul.f32 %v3558_v27, %v3558_v27  ;;  %v938_v62 = vmul.f32 64.0, %v906_v3 }
 0x1ab   : > { %901 = vadd.xlane.f32.xlu1 %v838_v59  ;;  %v907_v59 = vmul.f32 %v3257_v20, %v3257_v20 }
 0x1ad   : > { %v939_v44 = vmul.f32 64.0, %v907_v59  ;;  %v914_v59 = vmul.f32 %v3336_v57, %v3336_v57  ;;  %v918_v57 = vmul.f32 %v3381_v11, %v3381_v11 }
 0x1af   : > { %v3600_v11 = vmul.f32 64.0, %v918_v57 }
 0x1f4   : > { %v840_v5 = vpop.xlane.xlu0 %839 }
 0x1f5   : > { %v967_v6 = vsub.f32 %v840_v5, %v935_v13  ;;  %v909_v5 = vmul.f32 %v3275_v37, %v3275_v37  ;;  %v912_v37 = vmul.f32 %v3315_v63, %v3315_v63 }
 0x1f7   : > { %v999_v55 = vmul.f32 0.015625, %v967_v6 }
 0x1f8   : > { %v842_v27 = vpop.xlane.xlu1 %841  ;;  %v844_v33 = vpop.xlane.xlu0 %843 }
 0x1f9   : > { %v1031_v24 = vadd.f32 1e-05, %v999_v55  ;;  %v968_v21 = vsub.f32 %v842_v27, %v936_v40  ;;  %v969_v36 = vsub.f32 %v844_v33, %v937_v35  ;;  %v941_v40 = vmul.f32 64.0, %v909_v5 }
 0x1fa   : > { %v942_v33 = vmul.f32 64.0, %v910_v52  ;;  %v916_v5 = vmul.f32 %v3360_v51, %v3360_v51 }
 0x1fb   : > { %2750 = vrsqrt.f32 %v1031_v24  ;;  %v1000_v13 = vmul.f32 0.015625, %v968_v21  ;;  %v1001_v17 = vmul.f32 0.015625, %v969_v36  ;;  %v943_v24 = vmul.f32 64.0, %v911_v42 }
 0x1fc   : > { %v846_v20 = vpop.xlane.xlu1 %845  ;;  %v848_v6 = vpop.xlane.xlu0 %847 }
 0x1fd   : > { %v1032_v55 = vadd.f32 1e-05, %v1000_v13  ;;  %v1033_v27 = vadd.f32 1e-05, %v1001_v17  ;;  %v970_v35 = vsub.f32 %v846_v20, %v938_v62  ;;  %v971_v3 = vsub.f32 %v848_v6, %v939_v44 }
 0x1fe   : > { %v915_v62 = vmul.f32 %v3338_v1, %v3338_v1  ;;  %v944_v17 = vmul.f32 64.0, %v912_v37  ;;  %v945_v44 = vmul.f32 64.0, %v913_v48  ;;  %v917_v20 = vmul.f32 %v3362_v8, %v3362_v8 }
 0x1ff   : > { %2752 = vrsqrt.f32 %v1032_v55  ;;  %v1002_v36 = vmul.f32 0.015625, %v970_v35  ;;  %v1003_v21 = vmul.f32 0.015625, %v971_v3  ;;  %v946_v55 = vmul.f32 64.0, %v914_v59 }
 0x200   : > { %2754 = vrsqrt.f32 %v1033_v27  ;;  %v850_v50 = vpop.xlane.xlu1 %849  ;;  %v852_v47 = vpop.xlane.xlu0 %851  ;;  %v947_v51 = vmul.f32 64.0, %v915_v62  ;;  %v3594_v35 = vmul.f32 64.0, %v916_v5  ;;  %v3598_v48 = vmul.f32 64.0, %v917_v20 }
 0x201   : > { %v1034_v63 = vadd.f32 1e-05, %v1002_v36  ;;  %v1035_v52 = vadd.f32 1e-05, %v1003_v21  ;;  %v972_v13 = vsub.f32 %v850_v50, %v940_v60  ;;  %v973_v10 = vsub.f32 %v852_v47, %v941_v40 }
 0x202   : > { %v919_v60 = vmul.f32 %v3383_v43, %v3383_v43  ;;  %v920_v36 = vmul.f32 %v3405_v18, %v3405_v18  ;;  %v921_v21 = vmul.f32 %v3407_v56, %v3407_v56  ;;  %v922_v43 = vmul.f32 %v3426_v25, %v3426_v25  ;;  %v3617_v25 = vld [vmem:[%s4638_s2 + $0x1] ss:$0 sm:$0xff] }
 0x203   : > { %2756 = vrsqrt.f32 %v1034_v63  ;;  %v1004_v6 = vmul.f32 0.015625, %v972_v13  ;;  %v1005_v42 = vmul.f32 0.015625, %v973_v10  ;;  %v923_v5 = vmul.f32 %v3428_v2, %v3428_v2 }
 0x204   : > { %2758 = vrsqrt.f32 %v1035_v52  ;;  %v854_v1 = vpop.xlane.xlu1 %853  ;;  %v856_v27 = vpop.xlane.xlu0 %855  ;;  %v3608_v62 = vmul.f32 64.0, %v919_v60  ;;  %v924_v18 = vmul.f32 %v3450_v26, %v3450_v26  ;;  %v3620_v20 = vmul.f32 64.0, %v920_v36 }
 0x205   : > { %v1036_v3 = vadd.f32 1e-05, %v1004_v6  ;;  %v1037_v40 = vadd.f32 1e-05, %v1005_v42  ;;  %v974_v37 = vsub.f32 %v854_v1, %v942_v33  ;;  %v975_v8 = vsub.f32 %v856_v27, %v943_v24 }
 0x206   : > { %v3622_v57 = vmul.f32 64.0, %v921_v21  ;;  %v925_v2 = vmul.f32 %v3452_v29, %v3452_v29  ;;  %v3634_v60 = vmul.f32 64.0, %v923_v5 }
 0x207   : > { %2760 = vrsqrt.f32 %v1036_v3  ;;  %v1006_v59 = vmul.f32 0.015625, %v974_v37  ;;  %v1007_v50 = vmul.f32 0.015625, %v975_v8  ;;  %v3636_v3 = vmul.f32 64.0, %v924_v18 }
 0x208   : > { %v2751_v47 = vpop.eup %2750  ;;  %2762 = vrsqrt.f32 %v1037_v40  ;;  %v858_v33 = vpop.xlane.xlu1 %857 }
 0x209   : > { %v860_v24 = vpop.xlane.xlu0 %859  ;;  %v1038_v63 = vadd.f32 1e-05, %v1006_v59  ;;  %v1039_v56 = vadd.f32 1e-05, %v1007_v50  ;;  %v976_v52 = vsub.f32 %v858_v33, %v944_v17  ;;  %v1095_v10 = vmul.f32 %v2751_v47, %v3237_v12  ;;  %v3629_v17 = vld [vmem:[%s4638_s2 + $0x2] ss:$0 sm:$0xff] }
 0x20a   : > { %v977_v13 = vsub.f32 %v860_v24, %v945_v44  ;;  %v3631_v44 = vmul.f32 64.0, %v922_v43  ;;  %v3641_v43 = vmul.f32 64.0, %v925_v2  ;;  %v926_v24 = vmul.f32 %v3471_v32, %v3471_v32 }
 0x20b   : > { %2764 = vrsqrt.f32 %v1038_v63  ;;  %v1008_v26 = vmul.f32 0.015625, %v976_v52  ;;  %v1131_v27 = vmul.f32 %v3617_v25, %v1095_v10 }
 0x20c   : > { %v1009_v6 = vmul.f32 0.015625, %v977_v13  ;;  %v2753_v42 = vpop.eup %2752  ;;  %2766 = vrsqrt.f32 %v1039_v56  ;;  %v862_v12 = vpop.xlane.xlu1 %861 }
 0x20d   : > { %v864_v1 = vpop.xlane.xlu0 %863  ;;  %v2755_v29 = vpop.eup %2754  ;;  %v1040_v40 = vadd.f32 1e-05, %v1008_v26  ;;  %v978_v8 = vsub.f32 %v862_v12, %v946_v55  ;;  %v1167_v21 = vadd.f32 %v3629_v17, %v1131_v27  ;;  %v1096_v59 = vmul.f32 %v2753_v42, %v3253_v39 }
 0x20e   : > { %v1041_v37 = vadd.f32 1e-05, %v1009_v6  ;;  %v979_v36 = vsub.f32 %v864_v1, %v947_v51  ;;  %v1097_v50 = vmul.f32 %v2755_v29, %v3248_v19  ;;  %v927_v19 = vmul.f32 %v3473_v15, %v3473_v15 }
 0x20f   : > { %2768 = vrsqrt.f32 %v1040_v40  ;;  %v1010_v47 = vmul.f32 0.015625, %v978_v8  ;;  %2606 = vmatprep.mubr.f32.mxu1 %v1167_v21  ;;  %v1132_v51 = vmul.f32 %v3617_v25, %v1096_v59  ;;  %v3655_v1 = vmul.f32 64.0, %v926_v24 }
 0x210   : > { %v1011_v33 = vmul.f32 0.015625, %v979_v36  ;;  %v2757_v5 = vpop.eup %2756  ;;  %2770 = vrsqrt.f32 %v1041_v37  ;;  %v866_v18 = vpop.xlane.xlu1 %865  ;;  %v1133_v63 = vmul.f32 %v3617_v25, %v1097_v50  ;;  %v3659_v40 = vmul.f32 64.0, %v927_v19 }
 0x211   : > { %v868_v55 = vpop.xlane.xlu0 %867  ;;  %v2759_v39 = vpop.eup %2758  ;;  %v1042_v56 = vadd.f32 1e-05, %v1010_v47  ;;  %v980_v13 = vsub.f32 %v866_v18, %v3594_v35  ;;  %v1168_v32 = vadd.f32 %v3629_v17, %v1132_v51  ;;  %v1098_v26 = vmul.f32 %v2757_v5, %v3266_v41 }
 0x212   : > { %v1043_v52 = vadd.f32 1e-05, %v1011_v33  ;;  %v981_v10 = vsub.f32 %v868_v55, %v3598_v48  ;;  %v1169_v2 = vadd.f32 %v3629_v17, %v1133_v63  ;;  %v1099_v6 = vmul.f32 %v2759_v39, %v3271_v45 }
 0x213   : > { %2772 = vrsqrt.f32 %v1042_v56  ;;  %v1012_v42 = vmul.f32 0.015625, %v980_v13  ;;  %2607 = vmatmul.mubr.f32.vlgmr.msra.gmra.mxu1 %v1168_v32  ;;  %v1134_v48 = vmul.f32 %v3617_v25, %v1098_v26  ;;  %v928_v5 = vmul.f32 %v3495_v38, %v3495_v38 }
 0x214   : > { %v1013_v12 = vmul.f32 0.015625, %v981_v10  ;;  %v2761_v15 = vpop.eup %2760  ;;  %2774 = vrsqrt.f32 %v1043_v52  ;;  %v870_v27 = vpop.xlane.xlu1 %869  ;;  %v1135_v29 = vmul.f32 %v3617_v25, %v1099_v6  ;;  %2609 = vmatprep.mubr.f32.mxu1 %v1169_v2 }
 0x215   : > { %v872_v35 = vpop.xlane.xlu0 %871  ;;  %v2763_v37 = vpop.eup %2762  ;;  %v1044_v41 = vadd.f32 1e-05, %v1012_v42  ;;  %v982_v45 = vsub.f32 %v870_v27, %v3600_v11  ;;  %v1170_v21 = vadd.f32 %v3629_v17, %v1134_v48  ;;  %v1100_v50 = vmul.f32 %v2761_v15, %v3284_v49 }
 0x216   : > { %v1045_v8 = vadd.f32 1e-05, %v1013_v12  ;;  %v983_v36 = vsub.f32 %v872_v35, %v3608_v62  ;;  %v1171_v59 = vadd.f32 %v3629_v17, %v1135_v29  ;;  %v1101_v47 = vmul.f32 %v2763_v37, %v3289_v53 }
 0x217   : > { %2776 = vrsqrt.f32 %v1044_v41  ;;  %v1014_v33 = vmul.f32 0.015625, %v982_v45  ;;  %2610 = vmatmul.mubr.f32.gmra.mxu1 %v1170_v21  ;;  %v1136_v62 = vmul.f32 %v3617_v25, %v1100_v50  ;;  %v929_v49 = vmul.f32 %v3497_v46, %v3497_v46 }
 0x218   : > { %v1015_v24 = vmul.f32 0.015625, %v983_v36  ;;  %v2765_v18 = vpop.eup %2764  ;;  %2778 = vrsqrt.f32 %v1045_v8  ;;  %v874_v11 = vpop.xlane.xlu1 %873  ;;  %v1137_v51 = vmul.f32 %v3617_v25, %v1101_v47  ;;  %2612 = vmatprep.mubr.f32.mxu1 %v1171_v59  ;;  %v3679_v46 = vmul.f32 64.0, %v928_v5 }
 0x219   : > { %v876_v55 = vpop.xlane.xlu0 %875  ;;  %v2767_v63 = vpop.eup %2766  ;;  %v1046_v53 = vadd.f32 1e-05, %v1014_v33  ;;  %v984_v39 = vsub.f32 %v874_v11, %v3620_v20  ;;  %v1172_v56 = vadd.f32 %v3629_v17, %v1136_v62  ;;  %v1102_v13 = vmul.f32 %v2765_v18, %v3305_v61 }
 0x21a   : > { %v1047_v19 = vadd.f32 1e-05, %v1015_v24  ;;  %v985_v38 = vsub.f32 %v876_v55, %v3622_v57  ;;  %v1173_v52 = vadd.f32 %v3629_v17, %v1137_v51  ;;  %v1103_v10 = vmul.f32 %v2767_v63, %v3310_v0 }
 0x21b   : > { %2780 = vrsqrt.f32 %v1046_v53  ;;  %v1016_v32 = vmul.f32 0.015625, %v984_v39  ;;  %2613 = vmatmul.mubr.f32.gmra.mxu1 %v1172_v56  ;;  %v1138_v57 = vmul.f32 %v3617_v25, %v1102_v13  ;;  %v3683_v12 = vmul.f32 64.0, %v929_v49 }
 0x21c   : > { %v1017_v2 = vmul.f32 0.015625, %v985_v38  ;;  %v2769_v26 = vpop.eup %2768  ;;  %2782 = vrsqrt.f32 %v1047_v19  ;;  %v878_v20 = vpop.xlane.xlu1 %877  ;;  %v1139_v42 = vmul.f32 %v3617_v25, %v1103_v10  ;;  %2615 = vmatprep.mubr.f32.mxu1 %v1173_v52  ;;  %v930_v36 = vmul.f32 %v3513_v34, %v3513_v34 }
 0x21d   : > { %v880_v6 = vpop.xlane.xlu0 %879  ;;  %v2771_v15 = vpop.eup %2770  ;;  %v1048_v61 = vadd.f32 1e-05, %v1016_v32  ;;  %v986_v0 = vsub.f32 %v878_v20, %v3631_v44  ;;  %v1174_v48 = vadd.f32 %v3629_v17, %v1138_v57  ;;  %v1104_v37 = vmul.f32 %v2769_v26, %v3326_v4 }
 0x21e   : > { %v1049_v27 = vadd.f32 1e-05, %v1017_v2  ;;  %v987_v35 = vsub.f32 %v880_v6, %v3634_v60  ;;  %v1175_v29 = vadd.f32 %v3629_v17, %v1139_v42  ;;  %v1105_v41 = vmul.f32 %v2771_v15, %v3331_v9 }
 0x21f   : > { %2784 = vrsqrt.f32 %v1048_v61  ;;  %v1018_v8 = vmul.f32 0.015625, %v986_v0  ;;  %2616 = vmatmul.mubr.f32.gmra.mxu1 %v1174_v48  ;;  %v1140_v60 = vmul.f32 %v3617_v25, %v1104_v37  ;;  %v931_v4 = vmul.f32 %v3515_v54, %v3515_v54 }
 0x220   : > { %v1019_v45 = vmul.f32 0.015625, %v987_v35  ;;  %v2773_v21 = vpop.eup %2772  ;;  %2786 = vrsqrt.f32 %v1049_v27  ;;  %v882_v44 = vpop.xlane.xlu1 %881  ;;  %v1141_v50 = vmul.f32 %v3617_v25, %v1105_v41  ;;  %2618 = vmatprep.mubr.f32.mxu1 %v1175_v29  ;;  %v3703_v54 = vmul.f32 64.0, %v930_v36 }
 0x221   : > { %v884_v59 = vpop.xlane.xlu0 %883  ;;  %v2775_v47 = vpop.eup %2774  ;;  %v1050_v9 = vadd.f32 1e-05, %v1018_v8  ;;  %v988_v24 = vsub.f32 %v882_v44, %v3636_v3  ;;  %v1176_v5 = vadd.f32 %v3629_v17, %v1140_v60  ;;  %v1106_v11 = vmul.f32 %v2773_v21, %v3350_v16 }
 0x222   : > { %v1051_v33 = vadd.f32 1e-05, %v1019_v45  ;;  %v989_v34 = vsub.f32 %v884_v59, %v3641_v43  ;;  %v1177_v18 = vadd.f32 %v3629_v17, %v1141_v50  ;;  %v1107_v55 = vmul.f32 %v2775_v47, %v3355_v58 }
 0x223   : > { %2788 = vrsqrt.f32 %v1050_v9  ;;  %v1020_v62 = vmul.f32 0.015625, %v988_v24  ;;  %2619 = vmatmul.mubr.f32.gmra.mxu1 %v1176_v5  ;;  %v1142_v43 = vmul.f32 %v3617_v25, %v1106_v11  ;;  %v963_v19 = vmul.f32 64.0, %v931_v4  ;;  %v4723_v9 = vld [vmem:[#allocation2_spill] sm:$0xff]  ;;  %v4724_v24 = vld [vmem:[#allocation15_spill] sm:$0xff] }
 0x224   : > { %v1021_v51 = vmul.f32 0.015625, %v989_v34  ;;  %v2777_v49 = vpop.eup %2776  ;;  %2790 = vrsqrt.f32 %v1051_v33  ;;  %v886_v3 = vpop.xlane.xlu1 %885  ;;  %v1143_v53 = vmul.f32 %v3617_v25, %v1107_v55  ;;  %2621 = vmatprep.mubr.f32.mxu1 %v1177_v18  ;;  %v933_v2 = vmul.f32 %v3533_v22, %v3533_v22 }
 0x225   : > { %v888_v63 = vpop.xlane.xlu0 %887  ;;  %v2779_v39 = vpop.eup %2778  ;;  %v1052_v38 = vadd.f32 1e-05, %v1020_v62  ;;  %v990_v58 = vsub.f32 %v886_v3, %v3655_v1  ;;  %v1178_v52 = vadd.f32 %v3629_v17, %v1142_v43  ;;  %v1108_v10 = vmul.f32 %v2777_v49, %v3374_v23 }
 0x226   : > { %v1053_v16 = vadd.f32 1e-05, %v1021_v51  ;;  %v991_v56 = vsub.f32 %v888_v63, %v3659_v40  ;;  %v1179_v13 = vadd.f32 %v3629_v17, %v1143_v53  ;;  %v1109_v32 = vmul.f32 %v2779_v39, %v3379_v14  ;;  %v4725_v39 = vld [vmem:[#allocation3_spill] sm:$0xff] }
 0x227   : > { %2792 = vrsqrt.f32 %v1052_v38  ;;  %v1022_v26 = vmul.f32 0.015625, %v990_v58  ;;  %2622 = vmatmul.mubr.f32.gmra.mxu1 %v1178_v52  ;;  %v1144_v40 = vmul.f32 %v3617_v25, %v1108_v10  ;;  %v932_v23 = vmul.f32 %v3531_v7, %v3531_v7 }
 0x228   : > { %v1023_v20 = vmul.f32 0.015625, %v991_v56  ;;  %v2781_v6 = vpop.eup %2780  ;;  %2794 = vrsqrt.f32 %v1053_v16  ;;  %v890_v1 = vpop.xlane.xlu1 %889  ;;  %v1145_v42 = vmul.f32 %v3617_v25, %v1109_v32  ;;  %2624 = vmatprep.mubr.f32.mxu1 %v1179_v13  ;;  %v965_v7 = vmul.f32 64.0, %v933_v2  ;;  %v4726_v16 = vld [vmem:[#allocation4_spill] sm:$0xff] }
 0x229   : > { %v892_v57 = vpop.xlane.xlu0 %891  ;;  %v2783_v15 = vpop.eup %2782  ;;  %v1054_v14 = vadd.f32 1e-05, %v1022_v26  ;;  %v992_v22 = vsub.f32 %v890_v1, %v3679_v46  ;;  %v1180_v0 = vadd.f32 %v3629_v17, %v1144_v40  ;;  %v1110_v48 = vmul.f32 %v2781_v6, %v3395_v28  ;;  %v4727_v40 = vld [vmem:[#allocation5_spill] sm:$0xff] }
 0x22a   : > { %v1055_v61 = vadd.f32 1e-05, %v1023_v20  ;;  %v993_v27 = vsub.f32 %v892_v57, %v3683_v12  ;;  %v1181_v35 = vadd.f32 %v3629_v17, %v1145_v42  ;;  %v1111_v29 = vmul.f32 %v2783_v15, %v3400_v30 }
 0x22b   : > { %2796 = vrsqrt.f32 %v1054_v14  ;;  %v1024_v37 = vmul.f32 0.015625, %v992_v22  ;;  %2625 = vmatmul.mubr.f32.gmra.mxu1 %v1180_v0  ;;  %v1146_v36 = vmul.f32 %v3617_v25, %v1110_v48  ;;  %v964_v12 = vmul.f32 64.0, %v932_v23  ;;  %v4728_v14 = vld [vmem:[#allocation6_spill] sm:$0xff] }
 0x22c   : > { %v1025_v41 = vmul.f32 0.015625, %v993_v27  ;;  %v2785_v8 = vpop.eup %2784  ;;  %2798 = vrsqrt.f32 %v1055_v61  ;;  %v894_v45 = vpop.xlane.xlu1 %893  ;;  %v1147_v21 = vmul.f32 %v3617_v25, %v1111_v29  ;;  %2627 = vmatprep.mubr.f32.mxu1 %v1181_v35  ;;  %v934_v34 = vmul.f32 %v4724_v24, %v4724_v24 }
 0x22d   : > { %v896_v46 = vpop.xlane.xlu0 %895  ;;  %v2787_v44 = vpop.eup %2786  ;;  %v1056_v59 = vadd.f32 1e-05, %v1024_v37  ;;  %v994_v28 = vsub.f32 %v894_v45, %v3703_v54  ;;  %v1182_v50 = vadd.f32 %v3629_v17, %v1146_v36  ;;  %v1112_v47 = vmul.f32 %v2785_v8, %v3419_v31  ;;  %v4730_v45 = vld [vmem:[#allocation8_spill] sm:$0xff] }
 0x22e   : > { %v1057_v60 = vadd.f32 1e-05, %v1025_v41  ;;  %v995_v30 = vsub.f32 %v896_v46, %v963_v19  ;;  %v1183_v4 = vadd.f32 %v3629_v17, %v1147_v21  ;;  %v1113_v33 = vmul.f32 %v2787_v44, %v4723_v9  ;;  %v4729_v41 = vld [vmem:[#allocation7_spill] sm:$0xff] }
 0x22f   : > { %2800 = vrsqrt.f32 %v1056_v59  ;;  %v1026_v5 = vmul.f32 0.015625, %v994_v28  ;;  %2628 = vmatmul.mubr.f32.gmra.mxu1 %v1182_v50  ;;  %v1148_v51 = vmul.f32 %v3617_v25, %v1112_v47  ;;  %v966_v13 = vmul.f32 64.0, %v934_v34  ;;  %v4732_v50 = vld [vmem:[#allocation10_spill] sm:$0xff] }
 0x230   : > { %v1027_v18 = vmul.f32 0.015625, %v995_v30  ;;  %v2789_v11 = vpop.eup %2788  ;;  %2802 = vrsqrt.f32 %v1057_v60  ;;  %v898_v55 = vpop.xlane.xlu1 %897  ;;  %v1149_v54 = vmul.f32 %v3617_v25, %v1113_v33  ;;  %2630 = vmatprep.mubr.f32.mxu1 %v1183_v4  ;;  %v4731_v60 = vld [vmem:[#allocation9_spill] sm:$0xff] }
 0x231   : > { %v900_v62 = vpop.xlane.xlu0 %899  ;;  %v2791_v49 = vpop.eup %2790  ;;  %v1058_v3 = vadd.f32 1e-05, %v1026_v5  ;;  %v996_v63 = vsub.f32 %v898_v55, %v964_v12  ;;  %v1184_v53 = vadd.f32 %v3629_v17, %v1148_v51  ;;  %v1114_v38 = vmul.f32 %v2789_v11, %v4725_v39  ;;  %v4733_v5 = vld [vmem:[#allocation11_spill] sm:$0xff]  ;;  %v4734_v55 = vld [vmem:[#allocation12_spill] sm:$0xff] }
 0x232   : > { %v1059_v31 = vadd.f32 1e-05, %v1027_v18  ;;  %v997_v43 = vsub.f32 %v900_v62, %v965_v7  ;;  %v1185_v19 = vadd.f32 %v3629_v17, %v1149_v54  ;;  %v1115_v58 = vmul.f32 %v2791_v49, %v4726_v16 }
 0x233   : > { %2804 = vrsqrt.f32 %v1058_v3  ;;  %v1028_v56 = vmul.f32 0.015625, %v996_v63  ;;  %2631 = vmatmul.mubr.f32.gmra.mxu1 %v1184_v53  ;;  %v1150_v2 = vmul.f32 %v3617_v25, %v1114_v38  ;;  %v4735_v63 = vld [vmem:[#allocation14_spill] sm:$0xff] }
 0x234   : > { %v1029_v52 = vmul.f32 0.015625, %v997_v43  ;;  %v2793_v10 = vpop.eup %2792  ;;  %2806 = vrsqrt.f32 %v1059_v31  ;;  %v902_v32 = vpop.xlane.xlu1 %901  ;;  %v1151_v26 = vmul.f32 %v3617_v25, %v1115_v58  ;;  %2633 = vmatprep.mubr.f32.mxu1 %v1185_v19  ;;  %v4736_v19 = vld [vmem:[#allocation13_spill] sm:$0xff] }
 0x235   : > { %v2795_v20 = vpop.eup %2794  ;;  %v1060_v6 = vadd.f32 1e-05, %v1028_v56  ;;  %v998_v57 = vsub.f32 %v902_v32, %v966_v13  ;;  %v1116_v42 = vmul.f32 %v2793_v10, %v4727_v40  ;;  %v1186_v23 = vadd.f32 %v3629_v17, %v1150_v2 }
 0x236   : > { %v1061_v1 = vadd.f32 1e-05, %v1029_v52  ;;  %v1187_v15 = vadd.f32 %v3629_v17, %v1151_v26  ;;  %v1117_v61 = vmul.f32 %v2795_v20, %v4728_v14  ;;  %v4737_v52 = vld [vmem:[#allocation16_spill] sm:$0xff]  ;;  %v3780_v26 = vld [vmem:[%s4640_s4] ss:$0 sm:$0xff] }
 0x237   : > { %2808 = vrsqrt.f32 %v1060_v6  ;;  %v1030_v22 = vmul.f32 0.015625, %v998_v57  ;;  %v1152_v27 = vmul.f32 %v3617_v25, %v1116_v42  ;;  %2634 = vmatmul.mubr.f32.gmra.mxu1 %v1186_v23 }
 0x238   : > { %v2797_v0 = vpop.eup %2796  ;;  %2810 = vrsqrt.f32 %v1061_v1  ;;  %v1153_v35 = vmul.f32 %v3617_v25, %v1117_v61  ;;  %2636 = vmatprep.mubr.f32.mxu1 %v1187_v15 }
 0x239   : > { %v2799_v48 = vpop.eup %2798  ;;  %v1062_v29 = vadd.f32 1e-05, %v1030_v22  ;;  %v1188_v37 = vadd.f32 %v3629_v17, %v1152_v27  ;;  %v1118_v7 = vmul.f32 %v2797_v0, %v4729_v41 }
 0x23a   : > { %v1189_v8 = vadd.f32 %v3629_v17, %v1153_v35  ;;  %v1119_v46 = vmul.f32 %v2799_v48, %v4730_v45 }
 0x23b   : > { %2812 = vrsqrt.f32 %v1062_v29  ;;  %v1154_v36 = vmul.f32 %v3617_v25, %v1118_v7  ;;  %2637 = vmatmul.mubr.f32.gmra.mxu1 %v1188_v37 }
 0x23c   : > { %v2801_v12 = vpop.eup %2800  ;;  %v1155_v21 = vmul.f32 %v3617_v25, %v1119_v46  ;;  %2639 = vmatprep.mubr.f32.mxu1 %v1189_v8 }
 0x23d   : > { %v2803_v44 = vpop.eup %2802  ;;  %v1190_v59 = vadd.f32 %v3629_v17, %v1154_v36  ;;  %v1120_v28 = vmul.f32 %v2801_v12, %v4731_v60 }
 0x23e   : > { %v1191_v30 = vadd.f32 %v3629_v17, %v1155_v21  ;;  %v1121_v4 = vmul.f32 %v2803_v44, %v4732_v50 }
 0x23f   : > { %v1156_v47 = vmul.f32 %v3617_v25, %v1120_v28  ;;  %2640 = vmatmul.mubr.f32.gmra.mxu1 %v1190_v59 }
 0x240   : > { %v2805_v9 = vpop.eup %2804  ;;  %v1157_v33 = vmul.f32 %v3617_v25, %v1121_v4  ;;  %2642 = vmatprep.mubr.f32.mxu1 %v1191_v30 }
 0x241   : > { %v2807_v24 = vpop.eup %2806  ;;  %v1192_v34 = vadd.f32 %v3629_v17, %v1156_v47  ;;  %v1122_v18 = vmul.f32 %v2805_v9, %v4733_v5 }
 0x242   : > { %v1193_v11 = vadd.f32 %v3629_v17, %v1157_v33  ;;  %v1123_v62 = vmul.f32 %v2807_v24, %v4734_v55 }
 0x243   : > { %v1158_v51 = vmul.f32 %v3617_v25, %v1122_v18  ;;  %2643 = vmatmul.mubr.f32.gmra.mxu1 %v1192_v34 }
 0x244   : > { %v2809_v54 = vpop.eup %2808  ;;  %v1159_v49 = vmul.f32 %v3617_v25, %v1123_v62  ;;  %2645 = vmatprep.mubr.f32.mxu1 %v1193_v11 }
 0x245   : > { %v2811_v3 = vpop.eup %2810  ;;  %v1194_v31 = vadd.f32 %v3629_v17, %v1158_v51  ;;  %v1124_v43 = vmul.f32 %v2809_v54, %v4735_v63 }
 0x246   : > { %v1195_v53 = vadd.f32 %v3629_v17, %v1159_v49  ;;  %v1125_v39 = vmul.f32 %v2811_v3, %v4736_v19 }
 0x247   : > { %v1160_v38 = vmul.f32 %v3617_v25, %v1124_v43  ;;  %2646 = vmatmul.mubr.f32.gmra.mxu1 %v1194_v31 }
 0x248   : > { %v2813_v16 = vpop.eup %2812  ;;  %v1161_v58 = vmul.f32 %v3617_v25, %v1125_v39  ;;  %2648 = vmatprep.mubr.f32.mxu1 %v1195_v53 }
 0x249   : > { %v1196_v56 = vadd.f32 %v3629_v17, %v1160_v38  ;;  %v1126_v13 = vmul.f32 %v2813_v16, %v4737_v52 }
 0x24a   : > { %v1197_v10 = vadd.f32 %v3629_v17, %v1161_v58 }
 0x24b   : > { %v1162_v32 = vmul.f32 %v3617_v25, %v1126_v13  ;;  %2649 = vmatmul.mubr.f32.gmra.mxu1 %v1196_v56 }
 0x24c   : > { %2651 = vmatprep.mubr.f32.mxu1 %v1197_v10 }
 0x24d   : > { %v1198_v2 = vadd.f32 %v3629_v17, %v1162_v32 }
 0x24f   : > { %2652 = vmatmul.mubr.f32.gmra.mxu1 %v1198_v2 }
 0x2d3   : > { %v2608_v20 = vpop.f32.mrf.mxu1 }
 0x2d4   : > { %v3783_v6 = vadd.f32 %v2608_v20, %v3780_v26 }
 0x2d5   : > { %v1286_v1 = vpop.f32.mrf.mxu1 }
 0x2d6   : > { %v1446_v57 = vmax.f32 %v3783_v6, 0.0  ;;  %v3787_v40 = vadd.f32 %v3780_v26, %v1286_v1 }
 0x2d7   : > { %v2611_v25 = vpop.f32.mrf.mxu1 }
 0x2d8   : > { %v1445_v42 = vmax.f32 %v3787_v40, 0.0  ;;  %v3791_v17 = vadd.f32 %v2611_v25, %v3780_v26  ;;  %1481 = vadd.xlane.f32.xlu1 %v1446_v57 }
 0x2d9   : > { %v1296_v23 = vpop.f32.mrf.mxu1 }
 0x2da   : > { %v1448_v15 = vmax.f32 %v3791_v17, 0.0  ;;  %v3797_v14 = vadd.f32 %v3780_v26, %v1296_v23  ;;  %1479 = vadd.xlane.f32.xlu0 %v1445_v42 }
 0x2db   : > { %v2614_v61 = vpop.f32.mrf.mxu1 }
 0x2dc   : > { %v1447_v22 = vmax.f32 %v3797_v14, 0.0  ;;  %v3803_v27 = vadd.f32 %v2614_v61, %v3780_v26  ;;  %1485 = vadd.xlane.f32.xlu1 %v1448_v15 }
 0x2dd   : > { %v1306_v0 = vpop.f32.mrf.mxu1 }
 0x2de   : > { %v1450_v35 = vmax.f32 %v3803_v27, 0.0  ;;  %v3809_v48 = vadd.f32 %v3780_v26, %v1306_v0  ;;  %1483 = vadd.xlane.f32.xlu0 %v1447_v22 }
 0x2df   : > { %v2617_v29 = vpop.f32.mrf.mxu1 }
 0x2e0   : > { %v1449_v37 = vmax.f32 %v3809_v48, 0.0  ;;  %v3815_v41 = vadd.f32 %v2617_v29, %v3780_v26  ;;  %1489 = vadd.xlane.f32.xlu1 %v1450_v35 }
 0x2e1   : > { %v1316_v7 = vpop.f32.mrf.mxu1 }
 0x2e2   : > { %v1452_v8 = vmax.f32 %v3815_v41, 0.0  ;;  %v3821_v45 = vadd.f32 %v3780_v26, %v1316_v7  ;;  %1487 = vadd.xlane.f32.xlu0 %v1449_v37 }
 0x2e3   : > { %v2620_v46 = vpop.f32.mrf.mxu1 }
 0x2e4   : > { %v1451_v36 = vmax.f32 %v3821_v45, 0.0  ;;  %v3827_v12 = vadd.f32 %v2620_v46, %v3780_v26  ;;  %1493 = vadd.xlane.f32.xlu1 %v1452_v8 }
 0x2e5   : > { %v1326_v21 = vpop.f32.mrf.mxu1 }
 0x2e6   : > { %v1454_v44 = vmax.f32 %v3827_v12, 0.0  ;;  %v3833_v59 = vadd.f32 %v3780_v26, %v1326_v21  ;;  %1491 = vadd.xlane.f32.xlu0 %v1451_v36 }
 0x2e7   : > { %v2623_v60 = vpop.f32.mrf.mxu1 }
 0x2e8   : > { %v1453_v28 = vmax.f32 %v3833_v59, 0.0  ;;  %v3839_v30 = vadd.f32 %v2623_v60, %v3780_v26  ;;  %1497 = vadd.xlane.f32.xlu1 %v1454_v44 }
 0x2e9   : > { %v1336_v50 = vpop.f32.mrf.mxu1 }
 0x2ea   : > { %v1456_v4 = vmax.f32 %v3839_v30, 0.0  ;;  %v3845_v47 = vadd.f32 %v3780_v26, %v1336_v50  ;;  %1495 = vadd.xlane.f32.xlu0 %v1453_v28 }
 0x2eb   : > { %v2626_v9 = vpop.f32.mrf.mxu1 }
 0x2ec   : > { %v1455_v33 = vmax.f32 %v3845_v47, 0.0  ;;  %v3851_v24 = vadd.f32 %v2626_v9, %v3780_v26  ;;  %1501 = vadd.xlane.f32.xlu1 %v1456_v4 }
 0x2ed   : > { %v1346_v34 = vpop.f32.mrf.mxu1 }
 0x2ee   : > { %v1458_v5 = vmax.f32 %v3851_v24, 0.0  ;;  %v3857_v18 = vadd.f32 %v3780_v26, %v1346_v34  ;;  %1499 = vadd.xlane.f32.xlu0 %v1455_v33 }
 0x2ef   : > { %v2629_v11 = vpop.f32.mrf.mxu1 }
 0x2f0   : > { %v1457_v55 = vmax.f32 %v3857_v18, 0.0  ;;  %v3863_v62 = vadd.f32 %v2629_v11, %v3780_v26  ;;  %1505 = vadd.xlane.f32.xlu1 %v1458_v5 }
 0x2f1   : > { %v1356_v51 = vpop.f32.mrf.mxu1 }
 0x2f2   : > { %v1460_v54 = vmax.f32 %v3863_v62, 0.0  ;;  %v3869_v49 = vadd.f32 %v3780_v26, %v1356_v51  ;;  %1503 = vadd.xlane.f32.xlu0 %v1457_v55 }
 0x2f3   : > { %v2632_v3 = vpop.f32.mrf.mxu1 }
 0x2f4   : > { %v1459_v31 = vmax.f32 %v3869_v49, 0.0  ;;  %v3875_v63 = vadd.f32 %v2632_v3, %v3780_v26  ;;  %1509 = vadd.xlane.f32.xlu1 %v1460_v54 }
 0x2f5   : > { %v1366_v43 = vpop.f32.mrf.mxu1 }
 0x2f6   : > { %v1462_v53 = vmax.f32 %v3875_v63, 0.0  ;;  %v3881_v19 = vadd.f32 %v3780_v26, %v1366_v43  ;;  %1507 = vadd.xlane.f32.xlu0 %v1459_v31 }
 0x2f7   : > { %v2635_v39 = vpop.f32.mrf.mxu1 }
 0x2f8   : > { %v1461_v38 = vmax.f32 %v3881_v19, 0.0  ;;  %v3887_v16 = vadd.f32 %v2635_v39, %v3780_v26  ;;  %1513 = vadd.xlane.f32.xlu1 %v1462_v53 }
 0x2f9   : > { %v1376_v58 = vpop.f32.mrf.mxu1 }
 0x2fa   : > { %v1464_v56 = vmax.f32 %v3887_v16, 0.0  ;;  %v3893_v52 = vadd.f32 %v3780_v26, %v1376_v58  ;;  %1511 = vadd.xlane.f32.xlu0 %v1461_v38 }
 0x2fb   : > { %v2638_v13 = vpop.f32.mrf.mxu1 }
 0x2fc   : > { %v1463_v10 = vmax.f32 %v3893_v52, 0.0  ;;  %v3899_v32 = vadd.f32 %v2638_v13, %v3780_v26  ;;  %1517 = vadd.xlane.f32.xlu1 %v1464_v56 }
 0x2fd   : > { %v1386_v2 = vpop.f32.mrf.mxu1 }
 0x2fe   : > { %v1466_v20 = vmax.f32 %v3899_v32, 0.0  ;;  %v3905_v1 = vadd.f32 %v3780_v26, %v1386_v2  ;;  %1515 = vadd.xlane.f32.xlu0 %v1463_v10 }
 0x2ff   : > { %v2641_v25 = vpop.f32.mrf.mxu1 }
 0x300   : > { %v1465_v23 = vmax.f32 %v3905_v1, 0.0  ;;  %v3911_v61 = vadd.f32 %v2641_v25, %v3780_v26  ;;  %1521 = vadd.xlane.f32.xlu1 %v1466_v20 }
 0x301   : > { %v1396_v0 = vpop.f32.mrf.mxu1 }
 0x302   : > { %v4680_v29 = vmax.f32 %v3911_v61, 0.0  ;;  %v3917_v7 = vadd.f32 %v3780_v26, %v1396_v0  ;;  %1519 = vadd.xlane.f32.xlu0 %v1465_v23 }
 0x303   : > { %v2644_v46 = vpop.f32.mrf.mxu1 }
 0x304   : > { %v4679_v21 = vmax.f32 %v3917_v7, 0.0  ;;  %v3923_v60 = vadd.f32 %v2644_v46, %v3780_v26  ;;  %1525 = vadd.xlane.f32.xlu1 %v4680_v29 }
 0x305   : > { %v1406_v50 = vpop.f32.mrf.mxu1 }
 0x306   : > { %v4673_v9 = vmax.f32 %v3923_v60, 0.0  ;;  %v3929_v34 = vadd.f32 %v3780_v26, %v1406_v50  ;;  %1523 = vadd.xlane.f32.xlu0 %v4679_v21 }
 0x307   : > { %v2647_v11 = vpop.f32.mrf.mxu1 }
 0x308   : > { %v4671_v51 = vmax.f32 %v3929_v34, 0.0  ;;  %v3935_v3 = vadd.f32 %v2647_v11, %v3780_v26  ;;  %1529 = vadd.xlane.f32.xlu1 %v4673_v9 }
 0x309   : > { %v1416_v43 = vpop.f32.mrf.mxu1 }
 0x30a   : > { %v4672_v39 = vmax.f32 %v3935_v3, 0.0  ;;  %v3941_v58 = vadd.f32 %v3780_v26, %v1416_v43  ;;  %1527 = vadd.xlane.f32.xlu0 %v4671_v51 }
 0x30b   : > { %v2650_v13 = vpop.f32.mrf.mxu1 }
 0x30c   : > { %v4678_v2 = vmax.f32 %v3941_v58, 0.0  ;;  %v3947_v25 = vadd.f32 %v2650_v13, %v3780_v26  ;;  %1533 = vadd.xlane.f32.xlu1 %v4672_v39 }
 0x30d   : > { %v1426_v0 = vpop.f32.mrf.mxu1 }
 0x30e   : > { %v4675_v46 = vmax.f32 %v3947_v25, 0.0  ;;  %v3953_v50 = vadd.f32 %v3780_v26, %v1426_v0  ;;  %1531 = vadd.xlane.f32.xlu0 %v4678_v2 }
 0x30f   : > { %v2653_v11 = vpop.f32.mrf.mxu1 }
 0x310   : > { %v4674_v43 = vmax.f32 %v3953_v50, 0.0  ;;  %v3959_v51 = vadd.f32 %v2653_v11, %v3780_v26  ;;  %1537 = vadd.xlane.f32.xlu1 %v4675_v46  ;;  %v2014_v11 = vld [vmem:[%s4641_s5 + $0x78] sm:$0xff] }
 0x311   : > { %v1436_v13 = vpop.f32.mrf.mxu1  ;;  %2654 = vmatprep.subr.mxu0 %v2014_v11 }
 0x312   : > { %v4677_v39 = vmax.f32 %v3959_v51, 0.0  ;;  %v3965_v9 = vadd.f32 %v3780_v26, %v1436_v13  ;;  %1535 = vadd.xlane.f32.xlu0 %v4674_v43  ;;  %v2013_v26 = vld [vmem:[%s4641_s5 + $0x70] sm:$0xff]  ;;  %2655 = vmatpush3.msra.mxu0 %v2014_v11 }
 0x313   : > { %2656 = vmatprep.subr.mxu0 %v2013_v26 }
 0x314   : > { %v4676_v0 = vmax.f32 %v3965_v9, 0.0  ;;  %1541 = vadd.xlane.f32.xlu1 %v4677_v39  ;;  %2657 = vmatpush3.msra.mxu0 %v2013_v26 }
 0x316   : > { %1539 = vadd.xlane.f32.xlu0 %v4676_v0 }
 0x361   : > { %v1482_v13 = vpop.xlane.xlu1 %1481 }
 0x362   : > { %v3980_v43 = vmul.f32 0.020833334, %v1482_v13 }
 0x363   : > { %v1480_v46 = vpop.xlane.xlu0 %1479 }
 0x364   : > { %v3985_v0 = vsub.f32 %v1446_v57, %v3980_v43  ;;  %v3987_v39 = vmul.f32 0.020833334, %v1480_v46 }
 0x365   : > { %v1486_v2 = vpop.xlane.xlu1 %1485 }
 0x366   : > { %v3992_v21 = vsub.f32 %v1445_v42, %v3987_v39  ;;  %v3994_v11 = vmul.f32 0.020833334, %v1486_v2  ;;  %v1608_v26 = vmul.f32 %v3985_v0, %v3985_v0 }
 0x367   : > { %v1484_v13 = vpop.xlane.xlu0 %1483 }
 0x368   : > { %v4001_v6 = vsub.f32 %v1448_v15, %v3994_v11  ;;  %v4003_v57 = vmul.f32 0.020833334, %v1484_v13  ;;  %1641 = vadd.xlane.f32.xlu1 %v1608_v26  ;;  %v1607_v46 = vmul.f32 %v3992_v21, %v3992_v21 }
 0x369   : > { %v1490_v40 = vpop.xlane.xlu1 %1489 }
 0x36a   : > { %v4010_v42 = vsub.f32 %v1447_v22, %v4003_v57  ;;  %v4012_v2 = vmul.f32 0.020833334, %v1490_v40  ;;  %1639 = vadd.xlane.f32.xlu0 %v1607_v46  ;;  %v1610_v17 = vmul.f32 %v4001_v6, %v4001_v6 }
 0x36b   : > { %v1488_v15 = vpop.xlane.xlu0 %1487 }
 0x36c   : > { %v4019_v26 = vsub.f32 %v1450_v35, %v4012_v2  ;;  %v4021_v13 = vmul.f32 0.020833334, %v1488_v15  ;;  %1645 = vadd.xlane.f32.xlu1 %v1610_v17  ;;  %v1609_v14 = vmul.f32 %v4010_v42, %v4010_v42 }
 0x36d   : > { %v1494_v22 = vpop.xlane.xlu1 %1493 }
 0x36e   : > { %v4028_v46 = vsub.f32 %v1449_v37, %v4021_v13  ;;  %v4030_v40 = vmul.f32 0.020833334, %v1494_v22  ;;  %1643 = vadd.xlane.f32.xlu0 %v1609_v14  ;;  %v1612_v27 = vmul.f32 %v4019_v26, %v4019_v26 }
 0x36f   : > { %v1492_v35 = vpop.xlane.xlu0 %1491 }
 0x370   : > { %v4037_v17 = vsub.f32 %v1452_v8, %v4030_v40  ;;  %v4039_v15 = vmul.f32 0.020833334, %v1492_v35  ;;  %1649 = vadd.xlane.f32.xlu1 %v1612_v27  ;;  %v1611_v48 = vmul.f32 %v4028_v46, %v4028_v46  ;;  %v2012_v27 = vld [vmem:[%s4641_s5 + $0x68] sm:$0xff] }
 0x371   : > { %v1498_v37 = vpop.xlane.xlu1 %1497  ;;  %2658 = vmatprep.subr.mxu0 %v2012_v27 }
 0x372   : > { %v4046_v14 = vsub.f32 %v1451_v36, %v4039_v15  ;;  %v4048_v22 = vmul.f32 0.020833334, %v1498_v37  ;;  %1647 = vadd.xlane.f32.xlu0 %v1611_v48  ;;  %v1614_v41 = vmul.f32 %v4037_v17, %v4037_v17  ;;  %2659 = vmatpush3.msra.mxu0 %v2012_v27  ;;  %v2011_v48 = vld [vmem:[%s4641_s5 + $0x60] sm:$0xff] }
 0x373   : > { %v1496_v8 = vpop.xlane.xlu0 %1495  ;;  %2660 = vmatprep.subr.mxu0 %v2011_v48 }
 0x374   : > { %v4058_v35 = vsub.f32 %v1454_v44, %v4048_v22  ;;  %v4060_v29 = vmul.f32 0.020833334, %v1496_v8  ;;  %1653 = vadd.xlane.f32.xlu1 %v1614_v41  ;;  %v1613_v45 = vmul.f32 %v4046_v14, %v4046_v14  ;;  %2661 = vmatpush3.msra.mxu0 %v2011_v48  ;;  %v2010_v8 = vld [vmem:[%s4641_s5 + $0x58] sm:$0xff] }
 0x375   : > { %v1502_v36 = vpop.xlane.xlu1 %1501  ;;  %2662 = vmatprep.subr.mxu0 %v2010_v8 }
 0x376   : > { %v4070_v37 = vsub.f32 %v1453_v28, %v4060_v29  ;;  %v4072_v12 = vmul.f32 0.020833334, %v1502_v36  ;;  %1651 = vadd.xlane.f32.xlu0 %v1613_v45  ;;  %v1616_v44 = vmul.f32 %v4058_v35, %v4058_v35  ;;  %2663 = vmatpush3.msra.mxu0 %v2010_v8  ;;  %v2009_v36 = vld [vmem:[%s4641_s5 + $0x50] sm:$0xff] }
 0x377   : > { %v1500_v41 = vpop.xlane.xlu0 %1499  ;;  %2664 = vmatprep.subr.mxu0 %v2009_v36 }
 0x378   : > { %v4082_v27 = vsub.f32 %v1456_v4, %v4072_v12  ;;  %v4084_v59 = vmul.f32 0.020833334, %v1500_v41  ;;  %1657 = vadd.xlane.f32.xlu1 %v1616_v44  ;;  %v1615_v28 = vmul.f32 %v4070_v37, %v4070_v37  ;;  %2665 = vmatpush3.msra.mxu0 %v2009_v36  ;;  %v2008_v41 = vld [vmem:[%s4641_s5 + $0x48] sm:$0xff] }
 0x379   : > { %v1506_v45 = vpop.xlane.xlu1 %1505  ;;  %2666 = vmatprep.subr.mxu0 %v2008_v41 }
 0x37a   : > { %v4094_v48 = vsub.f32 %v1455_v33, %v4084_v59  ;;  %v4096_v30 = vmul.f32 0.020833334, %v1506_v45  ;;  %1655 = vadd.xlane.f32.xlu0 %v1615_v28  ;;  %v1618_v4 = vmul.f32 %v4082_v27, %v4082_v27  ;;  %2667 = vmatpush3.msra.mxu0 %v2008_v41  ;;  %v2007_v45 = vld [vmem:[%s4641_s5 + $0x40] sm:$0xff] }
 0x37b   : > { %v1504_v44 = vpop.xlane.xlu0 %1503  ;;  %2668 = vmatprep.subr.mxu0 %v2007_v45 }
 0x37c   : > { %v4106_v8 = vsub.f32 %v1458_v5, %v4096_v30  ;;  %v4108_v47 = vmul.f32 0.020833334, %v1504_v44  ;;  %1661 = vadd.xlane.f32.xlu1 %v1618_v4  ;;  %v1617_v33 = vmul.f32 %v4094_v48, %v4094_v48  ;;  %2669 = vmatpush3.msra.mxu0 %v2007_v45  ;;  %v2006_v44 = vld [vmem:[%s4641_s5 + $0x38] sm:$0xff] }
 0x37d   : > { %v1510_v28 = vpop.xlane.xlu1 %1509  ;;  %2670 = vmatprep.subr.mxu0 %v2006_v44 }
 0x37e   : > { %v4118_v36 = vsub.f32 %v1457_v55, %v4108_v47  ;;  %v4120_v24 = vmul.f32 0.020833334, %v1510_v28  ;;  %1659 = vadd.xlane.f32.xlu0 %v1617_v33  ;;  %v1620_v5 = vmul.f32 %v4106_v8, %v4106_v8  ;;  %2671 = vmatpush3.msra.mxu0 %v2006_v44  ;;  %v2005_v28 = vld [vmem:[%s4641_s5 + $0x30] sm:$0xff] }
 0x37f   : > { %v1508_v4 = vpop.xlane.xlu0 %1507  ;;  %2672 = vmatprep.subr.mxu0 %v2005_v28 }
 0x380   : > { %v4130_v41 = vsub.f32 %v1460_v54, %v4120_v24  ;;  %v4132_v18 = vmul.f32 0.020833334, %v1508_v4  ;;  %1665 = vadd.xlane.f32.xlu1 %v1620_v5  ;;  %v1619_v55 = vmul.f32 %v4118_v36, %v4118_v36  ;;  %2673 = vmatpush3.msra.mxu0 %v2005_v28  ;;  %v2004_v4 = vld [vmem:[%s4641_s5 + $0x28] sm:$0xff] }
 0x381   : > { %v1514_v33 = vpop.xlane.xlu1 %1513  ;;  %2674 = vmatprep.subr.mxu0 %v2004_v4 }
 0x382   : > { %v4142_v45 = vsub.f32 %v1459_v31, %v4132_v18  ;;  %v4144_v62 = vmul.f32 0.020833334, %v1514_v33  ;;  %1663 = vadd.xlane.f32.xlu0 %v1619_v55  ;;  %v1622_v54 = vmul.f32 %v4130_v41, %v4130_v41  ;;  %2675 = vmatpush3.msra.mxu0 %v2004_v4  ;;  %v2003_v33 = vld [vmem:[%s4641_s5 + $0x20] sm:$0xff] }
 0x383   : > { %v1512_v5 = vpop.xlane.xlu0 %1511  ;;  %2676 = vmatprep.subr.mxu0 %v2003_v33 }
 0x384   : > { %v4154_v44 = vsub.f32 %v1462_v53, %v4144_v62  ;;  %v4156_v49 = vmul.f32 0.020833334, %v1512_v5  ;;  %1669 = vadd.xlane.f32.xlu1 %v1622_v54  ;;  %v1621_v31 = vmul.f32 %v4142_v45, %v4142_v45  ;;  %2677 = vmatpush3.msra.mxu0 %v2003_v33  ;;  %v2002_v5 = vld [vmem:[%s4641_s5 + $0x18] sm:$0xff] }
 0x385   : > { %v1518_v55 = vpop.xlane.xlu1 %1517  ;;  %2678 = vmatprep.subr.mxu0 %v2002_v5 }
 0x386   : > { %v4166_v28 = vsub.f32 %v1461_v38, %v4156_v49  ;;  %v4168_v63 = vmul.f32 0.020833334, %v1518_v55  ;;  %1667 = vadd.xlane.f32.xlu0 %v1621_v31  ;;  %v1624_v53 = vmul.f32 %v4154_v44, %v4154_v44  ;;  %2679 = vmatpush3.msra.mxu0 %v2002_v5  ;;  %v2001_v55 = vld [vmem:[%s4641_s5 + $0x10] sm:$0xff] }
 0x387   : > { %v1516_v54 = vpop.xlane.xlu0 %1515  ;;  %2680 = vmatprep.subr.mxu0 %v2001_v55 }
 0x388   : > { %4738 = vst [vmem:[#allocation2_spill] sm:$0xff] %v4166_v28  ;;  %v4178_v4 = vsub.f32 %v1464_v56, %v4168_v63  ;;  %v4180_v19 = vmul.f32 0.020833334, %v1516_v54  ;;  %1673 = vadd.xlane.f32.xlu1 %v1624_v53  ;;  %v1623_v38 = vmul.f32 %v4166_v28, %v4166_v28  ;;  %2681 = vmatpush3.msra.mxu0 %v2001_v55  ;;  %v2000_v54 = vld [vmem:[%s4641_s5 + $0x8] sm:$0xff] }
 0x389   : > { %v1522_v31 = vpop.xlane.xlu1 %1521  ;;  %2682 = vmatprep.subr.mxu0 %v2000_v54 }
 0x38a   : > { %4739 = vst [vmem:[#allocation15_spill] sm:$0xff] %v4178_v4  ;;  %v4190_v33 = vsub.f32 %v1463_v10, %v4180_v19  ;;  %v4192_v16 = vmul.f32 0.020833334, %v1522_v31  ;;  %1671 = vadd.xlane.f32.xlu0 %v1623_v38  ;;  %v1626_v56 = vmul.f32 %v4178_v4, %v4178_v4  ;;  %2683 = vmatpush3.msra.mxu0 %v2000_v54  ;;  %v1999_v31 = vld [vmem:[%s4641_s5] sm:$0xff] }
 0x38b   : > { %v1520_v53 = vpop.xlane.xlu0 %1519  ;;  %2684 = vmatprep.subr.mxu0 %v1999_v31 }
 0x38c   : > { %4740 = vst [vmem:[#allocation3_spill] sm:$0xff] %v4190_v33  ;;  %v4202_v5 = vsub.f32 %v1466_v20, %v4192_v16  ;;  %v4204_v52 = vmul.f32 0.020833334, %v1520_v53  ;;  %1677 = vadd.xlane.f32.xlu1 %v1626_v56  ;;  %v1625_v10 = vmul.f32 %v4190_v33, %v4190_v33  ;;  %2685 = vmatpush3.msra.mxu0 %v1999_v31  ;;  %v4743_v53 = vmax.f32 %v3911_v61, 0.0 }
 0x38d   : > { %v1526_v38 = vpop.xlane.xlu1 %1525 }
 0x38e   : > { %4741 = vst [vmem:[#allocation4_spill] sm:$0xff] %v4202_v5  ;;  %v4214_v55 = vsub.f32 %v1465_v23, %v4204_v52  ;;  %v4216_v32 = vmul.f32 0.020833334, %v1526_v38  ;;  %1675 = vadd.xlane.f32.xlu0 %v1625_v10  ;;  %v1628_v20 = vmul.f32 %v4202_v5, %v4202_v5  ;;  %v4745_v10 = vmax.f32 %v3917_v7, 0.0 }
 0x38f   : > { %v1524_v56 = vpop.xlane.xlu0 %1523 }
 0x390   : > { %4742 = vst [vmem:[#allocation5_spill] sm:$0xff] %v4214_v55  ;;  %v4223_v54 = vsub.f32 %v4743_v53, %v4216_v32  ;;  %v4225_v33 = vmul.f32 0.020833334, %v1524_v56  ;;  %1681 = vadd.xlane.f32.xlu1 %v1628_v20  ;;  %v1627_v1 = vmul.f32 %v4214_v55, %v4214_v55  ;;  %v4747_v56 = vmax.f32 %v3923_v60, 0.0 }
 0x391   : > { %v1530_v23 = vpop.xlane.xlu1 %1529 }
 0x392   : > { %4744 = vst [vmem:[#allocation6_spill] sm:$0xff] %v4223_v54  ;;  %v4232_v38 = vsub.f32 %v4745_v10, %v4225_v33  ;;  %v4234_v5 = vmul.f32 0.020833334, %v1530_v23  ;;  %1679 = vadd.xlane.f32.xlu0 %v1627_v1  ;;  %v1630_v61 = vmul.f32 %v4223_v54, %v4223_v54  ;;  %v4749_v23 = vmax.f32 %v3929_v34, 0.0 }
 0x393   : > { %v1528_v31 = vpop.xlane.xlu0 %1527 }
 0x394   : > { %4746 = vst [vmem:[#allocation7_spill] sm:$0xff] %v4232_v38  ;;  %v4241_v20 = vsub.f32 %v4747_v56, %v4234_v5  ;;  %v4243_v53 = vmul.f32 0.020833334, %v1528_v31  ;;  %1685 = vadd.xlane.f32.xlu1 %v1630_v61  ;;  %v1629_v7 = vmul.f32 %v4232_v38, %v4232_v38  ;;  %v4751_v31 = vmax.f32 %v3935_v3, 0.0 }
 0x395   : > { %v1534_v10 = vpop.xlane.xlu1 %1533 }
 0x396   : > { %4748 = vst [vmem:[#allocation8_spill] sm:$0xff] %v4241_v20  ;;  %v4250_v1 = vsub.f32 %v4749_v23, %v4243_v53  ;;  %v4252_v55 = vmul.f32 0.020833334, %v1534_v10  ;;  %1683 = vadd.xlane.f32.xlu0 %v1629_v7  ;;  %v1632_v60 = vmul.f32 %v4241_v20, %v4241_v20  ;;  %v4753_v10 = vmax.f32 %v3941_v58, 0.0 }
 0x397   : > { %v1532_v56 = vpop.xlane.xlu0 %1531 }
 0x398   : > { %4750 = vst [vmem:[#allocation9_spill] sm:$0xff] %v4250_v1  ;;  %v4259_v61 = vsub.f32 %v4751_v31, %v4252_v55  ;;  %v4261_v54 = vmul.f32 0.020833334, %v1532_v56  ;;  %1689 = vadd.xlane.f32.xlu1 %v1632_v60  ;;  %v1631_v34 = vmul.f32 %v4250_v1, %v4250_v1  ;;  %v4755_v56 = vmax.f32 %v3947_v25, 0.0 }
 0x399   : > { %v1538_v23 = vpop.xlane.xlu1 %1537 }
 0x39a   : > { %4752 = vst [vmem:[#allocation10_spill] sm:$0xff] %v4259_v61  ;;  %v4268_v7 = vsub.f32 %v4753_v10, %v4261_v54  ;;  %v4270_v38 = vmul.f32 0.020833334, %v1538_v23  ;;  %1687 = vadd.xlane.f32.xlu0 %v1631_v34  ;;  %v1634_v3 = vmul.f32 %v4259_v61, %v4259_v61  ;;  %v4757_v23 = vmax.f32 %v3953_v50, 0.0 }
 0x39b   : > { %v1536_v31 = vpop.xlane.xlu0 %1535 }
 0x39c   : > { %4754 = vst [vmem:[#allocation11_spill] sm:$0xff] %v4268_v7  ;;  %v4277_v60 = vsub.f32 %v4755_v56, %v4270_v38  ;;  %v4279_v20 = vmul.f32 0.020833334, %v1536_v31  ;;  %1693 = vadd.xlane.f32.xlu1 %v1634_v3  ;;  %v1633_v58 = vmul.f32 %v4268_v7, %v4268_v7  ;;  %v4759_v31 = vmax.f32 %v3959_v51, 0.0 }
 0x39d   : > { %v1542_v10 = vpop.xlane.xlu1 %1541 }
 0x39e   : > { %4756 = vst [vmem:[#allocation12_spill] sm:$0xff] %v4277_v60  ;;  %v4286_v34 = vsub.f32 %v4757_v23, %v4279_v20  ;;  %v4288_v1 = vmul.f32 0.020833334, %v1542_v10  ;;  %1691 = vadd.xlane.f32.xlu0 %v1633_v58  ;;  %v1636_v25 = vmul.f32 %v4277_v60, %v4277_v60  ;;  %v4761_v10 = vmax.f32 %v3965_v9, 0.0 }
 0x39f   : > { %v1540_v56 = vpop.xlane.xlu0 %1539  ;;  %v1706_v9 = vmul.f32 %v3994_v11, %v3994_v11 }
 0x3a0   : > { %4758 = vst [vmem:[#allocation14_spill] sm:$0xff] %v4286_v34  ;;  %v4295_v3 = vsub.f32 %v4759_v31, %v4288_v1  ;;  %v4297_v61 = vmul.f32 0.020833334, %v1540_v56  ;;  %1697 = vadd.xlane.f32.xlu1 %v1636_v25  ;;  %v1635_v50 = vmul.f32 %v4286_v34, %v4286_v34  ;;  %v1704_v25 = vmul.f32 %v3980_v43, %v3980_v43 }
 0x3a1   : > { %v1703_v56 = vmul.f32 %v3987_v39, %v3987_v39  ;;  %v1738_v43 = vmul.f32 80.0, %v1706_v9  ;;  %v1707_v39 = vmul.f32 %v4021_v13, %v4021_v13  ;;  %v1712_v13 = vmul.f32 %v4048_v22, %v4048_v22 }
 0x3a2   : > { %4760 = vst [vmem:[#allocation13_spill] sm:$0xff] %v4295_v3  ;;  %v4304_v23 = vsub.f32 %v4761_v10, %v4297_v61  ;;  %1695 = vadd.xlane.f32.xlu0 %v1635_v50  ;;  %v1638_v58 = vmul.f32 %v4295_v3, %v4295_v3  ;;  %v1736_v31 = vmul.f32 80.0, %v1704_v25  ;;  %v1705_v50 = vmul.f32 %v4003_v57, %v4003_v57 }
 0x3a3   : > { %v1710_v57 = vmul.f32 %v4030_v40, %v4030_v40  ;;  %v1739_v40 = vmul.f32 80.0, %v1707_v39 }
 0x3a4   : > { %4762 = vst [vmem:[#allocation16_spill] sm:$0xff] %v4304_v23  ;;  %1701 = vadd.xlane.f32.xlu1 %v1638_v58  ;;  %v1637_v51 = vmul.f32 %v4304_v23, %v4304_v23  ;;  %v1735_v58 = vmul.f32 80.0, %v1703_v56  ;;  %v1708_v23 = vmul.f32 %v4012_v2, %v4012_v2  ;;  %v1737_v28 = vmul.f32 80.0, %v1705_v50 }
 0x3a5   : > { %v1709_v56 = vmul.f32 %v4039_v15, %v4039_v15  ;;  %v1742_v22 = vmul.f32 80.0, %v1710_v57  ;;  %v1717_v57 = vmul.f32 %v4132_v18, %v4132_v18 }
 0x3a6   : > { %1699 = vadd.xlane.f32.xlu0 %v1637_v51  ;;  %v1740_v2 = vmul.f32 80.0, %v1708_v23 }
 0x3f1   : > { %v1642_v10 = vpop.xlane.xlu1 %1641 }
 0x3f2   : > { %v1768_v3 = vsub.f32 %v1642_v10, %v1736_v31 }
 0x3f3   : > { %v1640_v51 = vpop.xlane.xlu0 %1639 }
 0x3f4   : > { %v1800_v34 = vmul.f32 0.020833334, %v1768_v3  ;;  %v1767_v60 = vsub.f32 %v1640_v51, %v1735_v58  ;;  %v1741_v51 = vmul.f32 80.0, %v1709_v56 }
 0x3f5   : > { %v1646_v7 = vpop.xlane.xlu1 %1645 }
 0x3f6   : > { %v1832_v4 = vadd.f32 1e-05, %v1800_v34  ;;  %v1799_v11 = vmul.f32 0.020833334, %v1767_v60  ;;  %v1770_v25 = vsub.f32 %v1646_v7, %v1738_v43  ;;  %v1711_v60 = vmul.f32 %v4060_v29, %v4060_v29 }
 0x3f7   : > { %v1644_v31 = vpop.xlane.xlu0 %1643  ;;  %v1714_v7 = vmul.f32 %v4072_v12, %v4072_v12  ;;  %v1715_v12 = vmul.f32 %v4108_v47, %v4108_v47 }
 0x3f8   : > { %2814 = vrsqrt.f32 %v1832_v4  ;;  %v1831_v3 = vadd.f32 1e-05, %v1799_v11  ;;  %v1802_v10 = vmul.f32 0.020833334, %v1770_v25  ;;  %v1769_v9 = vsub.f32 %v1644_v31, %v1737_v28 }
 0x3f9   : > { %v1650_v34 = vpop.xlane.xlu1 %1649  ;;  %v1713_v4 = vmul.f32 %v4084_v59, %v4084_v59  ;;  %v1716_v28 = vmul.f32 %v4096_v30, %v4096_v30  ;;  %v1744_v25 = vmul.f32 80.0, %v1712_v13  ;;  %v1743_v31 = vmul.f32 80.0, %v1711_v60 }
 0x3fa   : > { %2816 = vrsqrt.f32 %v1831_v3  ;;  %v1834_v50 = vadd.f32 1e-05, %v1802_v10  ;;  %v1801_v15 = vmul.f32 0.020833334, %v1769_v9  ;;  %v1772_v58 = vsub.f32 %v1650_v34, %v1740_v2 }
 0x3fb   : > { %v1648_v23 = vpop.xlane.xlu0 %1647  ;;  %v1746_v2 = vmul.f32 80.0, %v1714_v7  ;;  %v1718_v30 = vmul.f32 %v4120_v24, %v4120_v24  ;;  %v1745_v9 = vmul.f32 80.0, %v1713_v4  ;;  %v4342_v34 = vmul.f32 80.0, %v1716_v28 }
 0x3fc   : > { %2818 = vrsqrt.f32 %v1834_v50  ;;  %v1833_v29 = vadd.f32 1e-05, %v1801_v15  ;;  %v1804_v43 = vmul.f32 0.020833334, %v1772_v58  ;;  %v1771_v11 = vsub.f32 %v1648_v23, %v1739_v40 }
 0x3fd   : > { %v1654_v39 = vpop.xlane.xlu1 %1653  ;;  %v1720_v60 = vmul.f32 %v4144_v62, %v4144_v62  ;;  %v1719_v7 = vmul.f32 %v4156_v49, %v4156_v49  ;;  %v1722_v24 = vmul.f32 %v4168_v63, %v4168_v63  ;;  %v4350_v15 = vmul.f32 80.0, %v1715_v12 }
 0x3fe   : > { %2820 = vrsqrt.f32 %v1833_v29  ;;  %v1836_v3 = vadd.f32 1e-05, %v1804_v43  ;;  %v1803_v59 = vmul.f32 0.020833334, %v1771_v11  ;;  %v1774_v10 = vsub.f32 %v1654_v39, %v1742_v22 }
 0x3ff   : > { %v1652_v56 = vpop.xlane.xlu0 %1651  ;;  %v1721_v28 = vmul.f32 %v4180_v19, %v4180_v19  ;;  %v1724_v23 = vmul.f32 %v4192_v16, %v4192_v16  ;;  %v4356_v22 = vmul.f32 80.0, %v1718_v30  ;;  %v4358_v49 = vmul.f32 80.0, %v1717_v57 }
 0x400   : > { %2822 = vrsqrt.f32 %v1836_v3  ;;  %v1835_v47 = vadd.f32 1e-05, %v1803_v59  ;;  %v1806_v40 = vmul.f32 0.020833334, %v1774_v10  ;;  %v1773_v13 = vsub.f32 %v1652_v56, %v1741_v51  ;;  %v4371_v10 = vld [vmem:[%s4640_s4 + $0x1] ss:$0 sm:$0xff] }
 0x401   : > { %v1658_v50 = vpop.xlane.xlu1 %1657  ;;  %v1723_v11 = vmul.f32 %v4204_v52, %v4204_v52  ;;  %v4362_v39 = vmul.f32 80.0, %v1720_v60  ;;  %v4364_v19 = vmul.f32 80.0, %v1719_v7  ;;  %v1726_v52 = vmul.f32 %v4216_v32, %v4216_v32 }
 0x402   : > { %2824 = vrsqrt.f32 %v1835_v47  ;;  %v1838_v18 = vadd.f32 1e-05, %v1806_v40  ;;  %v1805_v58 = vmul.f32 0.020833334, %v1773_v13  ;;  %v1776_v4 = vsub.f32 %v1658_v50, %v1744_v25 }
 0x403   : > { %v1656_v62 = vpop.xlane.xlu0 %1655  ;;  %v4366_v25 = vmul.f32 80.0, %v1722_v24  ;;  %v4376_v56 = vmul.f32 80.0, %v1721_v28  ;;  %v4378_v47 = vmul.f32 80.0, %v1724_v23  ;;  %v1725_v7 = vmul.f32 %v4225_v33, %v4225_v33 }
 0x404   : > { %2826 = vrsqrt.f32 %v1838_v18  ;;  %v1837_v63 = vadd.f32 1e-05, %v1805_v58  ;;  %v1808_v51 = vmul.f32 0.020833334, %v1776_v4  ;;  %v1775_v29 = vsub.f32 %v1656_v62, %v1743_v31 }
 0x405   : > { %v2815_v43 = vpop.eup %2814  ;;  %v1662_v12 = vpop.xlane.xlu1 %1661  ;;  %v4384_v18 = vmul.f32 80.0, %v1723_v11  ;;  %v1728_v33 = vmul.f32 %v4234_v5, %v4234_v5 }
 0x406   : > { %2828 = vrsqrt.f32 %v1837_v63  ;;  %v1840_v16 = vadd.f32 1e-05, %v1808_v51  ;;  %v1807_v3 = vmul.f32 0.020833334, %v1775_v29  ;;  %v1778_v59 = vsub.f32 %v1662_v12, %v1746_v2 }
 0x407   : > { %v2817_v31 = vpop.eup %2816  ;;  %v1660_v30 = vpop.xlane.xlu0 %1659  ;;  %v1896_v57 = vmul.f32 %v2815_v43, %v3985_v0  ;;  %v4396_v63 = vmul.f32 80.0, %v1726_v52 }
 0x408   : > { %2830 = vrsqrt.f32 %v1840_v16  ;;  %v1839_v40 = vadd.f32 1e-05, %v1807_v3  ;;  %v1810_v13 = vmul.f32 0.020833334, %v1778_v59  ;;  %v1777_v2 = vsub.f32 %v1660_v30, %v1745_v9  ;;  %v4390_v9 = vld [vmem:[%s4640_s4 + $0x2] ss:$0 sm:$0xff] }
 0x409   : > { %v2819_v60 = vpop.eup %2818  ;;  %v1666_v24 = vpop.xlane.xlu1 %1665  ;;  %v1895_v50 = vmul.f32 %v2817_v31, %v3992_v21  ;;  %v1932_v32 = vmul.f32 %v4371_v10, %v1896_v57  ;;  %v1727_v30 = vmul.f32 %v4243_v53, %v4243_v53 }
 0x40a   : > { %2832 = vrsqrt.f32 %v1839_v40  ;;  %v1842_v0 = vadd.f32 1e-05, %v1810_v13  ;;  %v1809_v58 = vmul.f32 0.020833334, %v1777_v2  ;;  %v1780_v4 = vsub.f32 %v1666_v24, %v4342_v34 }
 0x40b   : > { %v2821_v28 = vpop.eup %2820  ;;  %v1664_v23 = vpop.xlane.xlu0 %1663  ;;  %v1931_v21 = vmul.f32 %v4371_v10, %v1895_v50  ;;  %v1898_v62 = vmul.f32 %v2819_v60, %v4001_v6  ;;  %v1968_v16 = vadd.f32 %v4390_v9, %v1932_v32  ;;  %v4408_v13 = vmul.f32 80.0, %v1725_v7 }
 0x40c   : > { %2834 = vrsqrt.f32 %v1842_v0  ;;  %v1841_v51 = vadd.f32 1e-05, %v1809_v58  ;;  %v1812_v29 = vmul.f32 0.020833334, %v1780_v4  ;;  %v1779_v34 = vsub.f32 %v1664_v23, %v4350_v15 }
 0x40d   : > { %v2823_v43 = vpop.eup %2822  ;;  %v1670_v11 = vpop.xlane.xlu1 %1669  ;;  %v1967_v12 = vadd.f32 %v4390_v9, %v1931_v21  ;;  %v1897_v5 = vmul.f32 %v2821_v28, %v4010_v42  ;;  %v1934_v3 = vmul.f32 %v4371_v10, %v1898_v62  ;;  %v1730_v28 = vmul.f32 %v4252_v55, %v4252_v55 }
 0x40e   : > { %2836 = vrsqrt.f32 %v1841_v51  ;;  %v1844_v59 = vadd.f32 1e-05, %v1812_v29  ;;  %v1811_v6 = vmul.f32 0.020833334, %v1779_v34  ;;  %v1782_v31 = vsub.f32 %v1670_v11, %v4356_v22 }
 0x40f   : > { %v2825_v52 = vpop.eup %2824  ;;  %2686 = vmatprep.mubr.f32.mxu0 %v1967_v12  ;;  %v1668_v15 = vpop.xlane.xlu0 %1667  ;;  %v1933_v57 = vmul.f32 %v4371_v10, %v1897_v5  ;;  %v1900_v40 = vmul.f32 %v2823_v43, %v4019_v26  ;;  %v1970_v53 = vadd.f32 %v4390_v9, %v1934_v3  ;;  %v4420_v62 = vmul.f32 80.0, %v1728_v33 }
 0x410   : > { %2838 = vrsqrt.f32 %v1844_v59  ;;  %v1843_v42 = vadd.f32 1e-05, %v1811_v6  ;;  %v1814_v2 = vmul.f32 0.020833334, %v1782_v31  ;;  %2687 = vmatmul.mubr.f32.vlgmr.msra.gmra.mxu0 %v1968_v16  ;;  %v1781_v60 = vsub.f32 %v1668_v15, %v4358_v49 }
 0x411   : > { %v2827_v24 = vpop.eup %2826  ;;  %v1674_v22 = vpop.xlane.xlu1 %1673  ;;  %v1969_v50 = vadd.f32 %v4390_v9, %v1933_v57  ;;  %v1899_v32 = vmul.f32 %v2825_v52, %v4028_v46  ;;  %v1936_v0 = vmul.f32 %v4371_v10, %v1900_v40  ;;  %v1729_v3 = vmul.f32 %v4261_v54, %v4261_v54 }
 0x412   : > { %2840 = vrsqrt.f32 %v1843_v42  ;;  %v1846_v26 = vadd.f32 1e-05, %v1814_v2  ;;  %v1813_v7 = vmul.f32 0.020833334, %v1781_v60  ;;  %v1784_v58 = vsub.f32 %v1674_v22, %v4362_v39 }
 0x413   : > { %v2829_v4 = vpop.eup %2828  ;;  %2689 = vmatprep.mubr.f32.mxu0 %v1969_v50  ;;  %v1672_v49 = vpop.xlane.xlu0 %1671  ;;  %v1935_v23 = vmul.f32 %v4371_v10, %v1899_v32  ;;  %v1902_v21 = vmul.f32 %v2827_v24, %v4037_v17  ;;  %v1972_v55 = vadd.f32 %v4390_v9, %v1936_v0  ;;  %v4432_v31 = vmul.f32 80.0, %v1727_v30 }
 0x414   : > { %2842 = vrsqrt.f32 %v1846_v26  ;;  %v1845_v46 = vadd.f32 1e-05, %v1813_v7  ;;  %v1816_v51 = vmul.f32 0.020833334, %v1784_v58  ;;  %2690 = vmatmul.mubr.f32.gmra.mxu0 %v1970_v53  ;;  %v1783_v29 = vsub.f32 %v1672_v49, %v4364_v19 }
 0x415   : > { %v2831_v34 = vpop.eup %2830  ;;  %v1678_v39 = vpop.xlane.xlu1 %1677  ;;  %v1971_v43 = vadd.f32 %v4390_v9, %v1935_v23  ;;  %v1901_v11 = vmul.f32 %v2829_v4, %v4046_v14  ;;  %v1938_v12 = vmul.f32 %v4371_v10, %v1902_v21  ;;  %v1732_v22 = vmul.f32 %v4270_v38, %v4270_v38 }
 0x416   : > { %2844 = vrsqrt.f32 %v1845_v46  ;;  %v1848_v17 = vadd.f32 1e-05, %v1816_v51  ;;  %v1815_v33 = vmul.f32 0.020833334, %v1783_v29  ;;  %v1786_v16 = vsub.f32 %v1678_v39, %v4366_v25 }
 0x417   : > { %v2833_v5 = vpop.eup %2832  ;;  %2692 = vmatprep.mubr.f32.mxu0 %v1971_v43  ;;  %v1676_v19 = vpop.xlane.xlu0 %1675  ;;  %v1937_v59 = vmul.f32 %v4371_v10, %v1901_v11  ;;  %v1904_v6 = vmul.f32 %v2831_v34, %v4058_v35  ;;  %v1974_v54 = vadd.f32 %v4390_v9, %v1938_v12  ;;  %v4444_v32 = vmul.f32 80.0, %v1730_v28 }
 0x418   : > { %2846 = vrsqrt.f32 %v1848_v17  ;;  %v1847_v14 = vadd.f32 1e-05, %v1815_v33  ;;  %v1818_v52 = vmul.f32 0.020833334, %v1786_v16  ;;  %2693 = vmatmul.mubr.f32.gmra.mxu0 %v1972_v55  ;;  %v1785_v15 = vsub.f32 %v1676_v19, %v4376_v56 }
 0x419   : > { %v2835_v57 = vpop.eup %2834  ;;  %v1682_v25 = vpop.xlane.xlu1 %1681  ;;  %v1973_v40 = vadd.f32 %v4390_v9, %v1937_v59  ;;  %v1903_v42 = vmul.f32 %v2833_v5, %v4070_v37  ;;  %v1940_v2 = vmul.f32 %v4371_v10, %v1904_v6  ;;  %v1731_v46 = vmul.f32 %v4279_v20, %v4279_v20 }
 0x41a   : > { %2848 = vrsqrt.f32 %v1847_v14  ;;  %v1850_v35 = vadd.f32 1e-05, %v1818_v52  ;;  %v1817_v30 = vmul.f32 0.020833334, %v1785_v15  ;;  %v1788_v60 = vsub.f32 %v1682_v25, %v4378_v47 }
 0x41b   : > { %v2837_v24 = vpop.eup %2836  ;;  %2695 = vmatprep.mubr.f32.mxu0 %v1973_v40  ;;  %v1680_v56 = vpop.xlane.xlu0 %1679  ;;  %v1939_v50 = vmul.f32 %v4371_v10, %v1903_v42  ;;  %v1906_v53 = vmul.f32 %v2835_v57, %v4082_v27  ;;  %v1976_v38 = vadd.f32 %v4390_v9, %v1940_v2  ;;  %v1761_v34 = vmul.f32 80.0, %v1729_v3 }
 0x41c   : > { %2850 = vrsqrt.f32 %v1850_v35  ;;  %v1849_v37 = vadd.f32 1e-05, %v1817_v30  ;;  %v1820_v0 = vmul.f32 0.020833334, %v1788_v60  ;;  %2696 = vmatmul.mubr.f32.gmra.mxu0 %v1974_v54  ;;  %v1787_v26 = vsub.f32 %v1680_v56, %v4384_v18 }
 0x41d   : > { %v2839_v7 = vpop.eup %2838  ;;  %v1686_v47 = vpop.xlane.xlu1 %1685  ;;  %v1975_v58 = vadd.f32 %v4390_v9, %v1939_v50  ;;  %v1905_v4 = vmul.f32 %v2837_v24, %v4094_v48  ;;  %v1942_v49 = vmul.f32 %v4371_v10, %v1906_v53  ;;  %v1734_v3 = vmul.f32 %v4288_v1, %v4288_v1 }
 0x41e   : > { %2852 = vrsqrt.f32 %v1849_v37  ;;  %v1852_v27 = vadd.f32 1e-05, %v1820_v0  ;;  %v1819_v28 = vmul.f32 0.020833334, %v1787_v26  ;;  %v1790_v23 = vsub.f32 %v1686_v47, %v4396_v63  ;;  %v4763_v0 = vld [vmem:[#allocation2_spill] sm:$0xff] }
 0x41f   : > { %v2841_v21 = vpop.eup %2840  ;;  %2698 = vmatprep.mubr.f32.mxu0 %v1975_v58  ;;  %v1684_v18 = vpop.xlane.xlu0 %1683  ;;  %v1941_v51 = vmul.f32 %v4371_v10, %v1905_v4  ;;  %v1908_v29 = vmul.f32 %v2839_v7, %v4106_v8  ;;  %v1978_v12 = vadd.f32 %v4390_v9, %v1942_v49  ;;  %v1764_v59 = vmul.f32 80.0, %v1732_v22 }
 0x420   : > { %2854 = vrsqrt.f32 %v1852_v27  ;;  %v1851_v48 = vadd.f32 1e-05, %v1819_v28  ;;  %v1822_v39 = vmul.f32 0.020833334, %v1790_v23  ;;  %2699 = vmatmul.mubr.f32.gmra.mxu0 %v1976_v38  ;;  %v1789_v43 = vsub.f32 %v1684_v18, %v4408_v13  ;;  %v4764_v28 = vld [vmem:[#allocation15_spill] sm:$0xff] }
 0x421   : > { %v2843_v55 = vpop.eup %2842  ;;  %v1690_v11 = vpop.xlane.xlu1 %1689  ;;  %v1977_v63 = vadd.f32 %v4390_v9, %v1941_v51  ;;  %v1907_v20 = vmul.f32 %v2841_v21, %v4118_v36  ;;  %v1944_v17 = vmul.f32 %v4371_v10, %v1908_v29  ;;  %v1733_v35 = vmul.f32 %v4297_v61, %v4297_v61 }
 0x422   : > { %2856 = vrsqrt.f32 %v1851_v48  ;;  %v1854_v33 = vadd.f32 1e-05, %v1822_v39  ;;  %v1821_v8 = vmul.f32 0.020833334, %v1789_v43  ;;  %v1792_v16 = vsub.f32 %v1690_v11, %v4420_v62  ;;  %v4765_v39 = vld [vmem:[#allocation3_spill] sm:$0xff] }
 0x423   : > { %v2845_v5 = vpop.eup %2844  ;;  %2701 = vmatprep.mubr.f32.mxu0 %v1977_v63  ;;  %v1688_v13 = vpop.xlane.xlu0 %1687  ;;  %v1943_v19 = vmul.f32 %v4371_v10, %v1907_v20  ;;  %v1910_v6 = vmul.f32 %v2843_v55, %v4130_v41  ;;  %v1980_v25 = vadd.f32 %v4390_v9, %v1944_v17  ;;  %v1763_v60 = vmul.f32 80.0, %v1731_v46 }
 0x424   : > { %2858 = vrsqrt.f32 %v1854_v33  ;;  %v1853_v36 = vadd.f32 1e-05, %v1821_v8  ;;  %v1824_v14 = vmul.f32 0.020833334, %v1792_v16  ;;  %2702 = vmatmul.mubr.f32.gmra.mxu0 %v1978_v12  ;;  %v1791_v52 = vsub.f32 %v1688_v13, %v4432_v31  ;;  %v4766_v8 = vld [vmem:[#allocation4_spill] sm:$0xff] }
 0x425   : > { %v2847_v15 = vpop.eup %2846  ;;  %v1694_v57 = vpop.xlane.xlu1 %1693  ;;  %v1979_v62 = vadd.f32 %v4390_v9, %v1943_v19  ;;  %v1909_v1 = vmul.f32 %v2845_v5, %v4142_v45  ;;  %v1946_v40 = vmul.f32 %v4371_v10, %v1910_v6  ;;  %v1766_v4 = vmul.f32 80.0, %v1734_v3 }
 0x426   : > { %2860 = vrsqrt.f32 %v1853_v36  ;;  %v1856_v54 = vadd.f32 1e-05, %v1824_v14  ;;  %v1823_v42 = vmul.f32 0.020833334, %v1791_v52  ;;  %v1794_v41 = vsub.f32 %v1694_v57, %v4444_v32  ;;  %v4767_v36 = vld [vmem:[#allocation5_spill] sm:$0xff] }
 0x427   : > { %v2849_v2 = vpop.eup %2848  ;;  %2704 = vmatprep.mubr.f32.mxu0 %v1979_v62  ;;  %v1692_v31 = vpop.xlane.xlu0 %1691  ;;  %v1945_v30 = vmul.f32 %v4371_v10, %v1909_v1  ;;  %v1912_v24 = vmul.f32 %v2847_v15, %v4154_v44  ;;  %v1982_v37 = vadd.f32 %v4390_v9, %v1946_v40  ;;  %v1765_v27 = vmul.f32 80.0, %v1733_v35  ;;  %v4768_v62 = vld [vmem:[#allocation6_spill] sm:$0xff] }
 0x428   : > { %2862 = vrsqrt.f32 %v1856_v54  ;;  %v1855_v45 = vadd.f32 1e-05, %v1823_v42  ;;  %v1826_v22 = vmul.f32 0.020833334, %v1794_v41  ;;  %2705 = vmatmul.mubr.f32.gmra.mxu0 %v1980_v25  ;;  %v1793_v56 = vsub.f32 %v1692_v31, %v1761_v34  ;;  %v4769_v42 = vld [vmem:[#allocation7_spill] sm:$0xff] }
 0x429   : > { %v2851_v50 = vpop.eup %2850  ;;  %v1698_v53 = vpop.xlane.xlu1 %1697  ;;  %v1981_v32 = vadd.f32 %v4390_v9, %v1945_v30  ;;  %v1911_v61 = vmul.f32 %v2849_v2, %v4763_v0  ;;  %v1948_v26 = vmul.f32 %v4371_v10, %v1912_v24  ;;  %v4770_v24 = vld [vmem:[#allocation8_spill] sm:$0xff] }
 0x42a   : > { %2864 = vrsqrt.f32 %v1855_v45  ;;  %v1858_v7 = vadd.f32 1e-05, %v1826_v22  ;;  %v1825_v47 = vmul.f32 0.020833334, %v1793_v56  ;;  %v1796_v58 = vsub.f32 %v1698_v53, %v1764_v59 }
 0x42b   : > { %v2853_v44 = vpop.eup %2852  ;;  %2707 = vmatprep.mubr.f32.mxu0 %v1981_v32  ;;  %v1696_v38 = vpop.xlane.xlu0 %1695  ;;  %v1947_v49 = vmul.f32 %v4371_v10, %v1911_v61  ;;  %v1914_v23 = vmul.f32 %v2851_v50, %v4764_v28  ;;  %v1984_v48 = vadd.f32 %v4390_v9, %v1948_v26  ;;  %v4771_v50 = vld [vmem:[#allocation9_spill] sm:$0xff]  ;;  %v4772_v26 = vld [vmem:[#allocation10_spill] sm:$0xff] }
 0x42c   : > { %2866 = vrsqrt.f32 %v1858_v7  ;;  %v1857_v21 = vadd.f32 1e-05, %v1825_v47  ;;  %v1828_v46 = vmul.f32 0.020833334, %v1796_v58  ;;  %2708 = vmatmul.mubr.f32.gmra.mxu0 %v1982_v37  ;;  %v1795_v18 = vsub.f32 %v1696_v38, %v1763_v60 }
 0x42d   : > { %v2855_v51 = vpop.eup %2854  ;;  %v1702_v29 = vpop.xlane.xlu1 %1701  ;;  %v1983_v34 = vadd.f32 %v4390_v9, %v1947_v49  ;;  %v1913_v43 = vmul.f32 %v2853_v44, %v4765_v39  ;;  %v1950_v55 = vmul.f32 %v4371_v10, %v1914_v23  ;;  %v4773_v44 = vld [vmem:[#allocation11_spill] sm:$0xff]  ;;  %v4774_v23 = vld [vmem:[#allocation12_spill] sm:$0xff] }
 0x42e   : > { %2868 = vrsqrt.f32 %v1857_v21  ;;  %v1860_v11 = vadd.f32 1e-05, %v1828_v46  ;;  %v1827_v63 = vmul.f32 0.020833334, %v1795_v18  ;;  %v1798_v12 = vsub.f32 %v1702_v29, %v1766_v4 }
 0x42f   : > { %v2857_v20 = vpop.eup %2856  ;;  %2710 = vmatprep.mubr.f32.mxu0 %v1983_v34  ;;  %v1700_v17 = vpop.xlane.xlu0 %1699  ;;  %v1949_v33 = vmul.f32 %v4371_v10, %v1913_v43  ;;  %v1916_v16 = vmul.f32 %v2855_v51, %v4766_v8  ;;  %v1986_v6 = vadd.f32 %v4390_v9, %v1950_v55  ;;  %v4775_v51 = vld [vmem:[#allocation14_spill] sm:$0xff]  ;;  %v4776_v55 = vld [vmem:[#allocation13_spill] sm:$0xff] }
 0x430   : > { %2870 = vrsqrt.f32 %v1860_v11  ;;  %v1859_v5 = vadd.f32 1e-05, %v1827_v63  ;;  %v1830_v3 = vmul.f32 0.020833334, %v1798_v12  ;;  %2711 = vmatmul.mubr.f32.gmra.mxu0 %v1984_v48  ;;  %v1797_v13 = vsub.f32 %v1700_v17, %v1765_v27 }
 0x431   : > { %v2859_v19 = vpop.eup %2858  ;;  %v1985_v59 = vadd.f32 %v4390_v9, %v1949_v33  ;;  %v1915_v14 = vmul.f32 %v2857_v20, %v4767_v36  ;;  %v1952_v52 = vmul.f32 %v4371_v10, %v1916_v16  ;;  %v4777_v20 = vld [vmem:[#allocation16_spill] sm:$0xff] }
 0x432   : > { %2872 = vrsqrt.f32 %v1859_v5  ;;  %v1862_v15 = vadd.f32 1e-05, %v1830_v3  ;;  %v1829_v57 = vmul.f32 0.020833334, %v1797_v13  ;;  %v1918_v25 = vmul.f32 %v2859_v19, %v4768_v62  ;;  %v4528_v13 = vld [vmem:[%s4642_s6] ss:$0 sm:$0xff] }
 0x433   : > { %v2861_v1 = vpop.eup %2860  ;;  %2713 = vmatprep.mubr.f32.mxu0 %v1985_v59  ;;  %v1951_v40 = vmul.f32 %v4371_v10, %v1915_v14  ;;  %v1988_v31 = vadd.f32 %v4390_v9, %v1952_v52 }
 0x434   : > { %2874 = vrsqrt.f32 %v1862_v15  ;;  %v1861_v54 = vadd.f32 1e-05, %v1829_v57  ;;  %2714 = vmatmul.mubr.f32.gmra.mxu0 %v1986_v6  ;;  %v1917_v41 = vmul.f32 %v2861_v1, %v4769_v42  ;;  %v1954_v60 = vmul.f32 %v4371_v10, %v1918_v25 }
 0x435   : > { %v2863_v2 = vpop.eup %2862  ;;  %v1987_v35 = vadd.f32 %v4390_v9, %v1951_v40 }
 0x436   : > { %2876 = vrsqrt.f32 %v1861_v54  ;;  %v1953_v30 = vmul.f32 %v4371_v10, %v1917_v41  ;;  %v1920_v45 = vmul.f32 %v2863_v2, %v4770_v24  ;;  %v1990_v37 = vadd.f32 %v4390_v9, %v1954_v60 }
 0x437   : > { %v2865_v22 = vpop.eup %2864  ;;  %2716 = vmatprep.mubr.f32.mxu0 %v1987_v35 }
 0x438   : > { %2717 = vmatmul.mubr.f32.gmra.mxu0 %v1988_v31  ;;  %v1989_v56 = vadd.f32 %v4390_v9, %v1953_v30  ;;  %v1919_v53 = vmul.f32 %v2865_v22, %v4771_v50  ;;  %v1956_v61 = vmul.f32 %v4371_v10, %v1920_v45 }
 0x439   : > { %v2867_v32 = vpop.eup %2866 }
 0x43a   : > { %2719 = vmatprep.mubr.f32.mxu0 %v1989_v56  ;;  %v1955_v0 = vmul.f32 %v4371_v10, %v1919_v53  ;;  %v1922_v7 = vmul.f32 %v2867_v32, %v4772_v26  ;;  %v1992_v49 = vadd.f32 %v4390_v9, %v1956_v61 }
 0x43b   : > { %v2869_v47 = vpop.eup %2868 }
 0x43c   : > { %2720 = vmatmul.mubr.f32.gmra.mxu0 %v1990_v37  ;;  %v1991_v58 = vadd.f32 %v4390_v9, %v1955_v0  ;;  %v1921_v38 = vmul.f32 %v2869_v47, %v4773_v44  ;;  %v1958_v28 = vmul.f32 %v4371_v10, %v1922_v7 }
 0x43d   : > { %v2871_v4 = vpop.eup %2870 }
 0x43e   : > { %2722 = vmatprep.mubr.f32.mxu0 %v1991_v58  ;;  %v1957_v27 = vmul.f32 %v4371_v10, %v1921_v38  ;;  %v1924_v21 = vmul.f32 %v2871_v4, %v4774_v23  ;;  %v1994_v48 = vadd.f32 %v4390_v9, %v1958_v28 }
 0x43f   : > { %v2873_v46 = vpop.eup %2872 }
 0x440   : > { %2723 = vmatmul.mubr.f32.gmra.mxu0 %v1992_v49  ;;  %v1993_v18 = vadd.f32 %v4390_v9, %v1957_v27  ;;  %v1923_v29 = vmul.f32 %v2873_v46, %v4775_v51  ;;  %v1960_v43 = vmul.f32 %v4371_v10, %v1924_v21 }
 0x441   : > { %v2875_v34 = vpop.eup %2874 }
 0x442   : > { %2725 = vmatprep.mubr.f32.mxu0 %v1993_v18  ;;  %v1959_v39 = vmul.f32 %v4371_v10, %v1923_v29  ;;  %v1926_v11 = vmul.f32 %v2875_v34, %v4776_v55  ;;  %v1996_v33 = vadd.f32 %v4390_v9, %v1960_v43 }
 0x443   : > { %v2877_v63 = vpop.eup %2876 }
 0x444   : > { %2726 = vmatmul.mubr.f32.gmra.mxu0 %v1994_v48  ;;  %v1995_v12 = vadd.f32 %v4390_v9, %v1959_v39  ;;  %v1925_v17 = vmul.f32 %v2877_v63, %v4777_v20  ;;  %v1962_v16 = vmul.f32 %v4371_v10, %v1926_v11 }
 0x446   : > { %2728 = vmatprep.mubr.f32.mxu0 %v1995_v12  ;;  %v1961_v8 = vmul.f32 %v4371_v10, %v1925_v17  ;;  %v1998_v3 = vadd.f32 %v4390_v9, %v1962_v16 }
 0x448   : > { %2729 = vmatmul.mubr.f32.gmra.mxu0 %v1996_v33  ;;  %v1997_v5 = vadd.f32 %v4390_v9, %v1961_v8 }
 0x44a   : > { %2731 = vmatprep.mubr.f32.mxu0 %v1997_v5 }
 0x44c   : > { %2732 = vmatmul.mubr.f32.gmra.mxu0 %v1998_v3 }
 0x4d0   : > { %v2688_v10 = vpop.f32.mrf.mxu0 }
 0x4d1   : > { %v2094_v9 = vadd.f32 %v2688_v10, %v4528_v13 }
 0x4d2   : > { %v2088_v19 = vpop.f32.mrf.mxu0 }
 0x4d3   : > { %2249 = vst.msk [vmem:[%s4535_s16 + $0x8] sm:$0xff] %vm2247_vm1, %v2094_v9  ;;  %v2089_v59 = vadd.f32 %v4528_v13, %v2088_v19 }
 0x4d4   : > { %v2691_v6 = vpop.f32.mrf.mxu0 }
 0x4d5   : > { %2248 = vst.msk [vmem:[%s4535_s16] sm:$0xff] %vm2247_vm1, %v2089_v59  ;;  %v2104_v36 = vadd.f32 %v2691_v6, %v4528_v13 }
 0x4d6   : > { %v2098_v14 = vpop.f32.mrf.mxu0 }
 0x4d7   : > { %2251 = vst.msk [vmem:[%s4535_s16 + $0x18] sm:$0xff] %vm2247_vm1, %v2104_v36  ;;  %v2099_v52 = vadd.f32 %v4528_v13, %v2098_v14 }
 0x4d8   : > { %v2694_v15 = vpop.f32.mrf.mxu0 }
 0x4d9   : > { %2250 = vst.msk [vmem:[%s4535_s16 + $0x10] sm:$0xff] %vm2247_vm1, %v2099_v52  ;;  %v2114_v57 = vadd.f32 %v2694_v15, %v4528_v13 }
 0x4da   : > { %v2108_v62 = vpop.f32.mrf.mxu0 }
 0x4db   : > { %2253 = vst.msk [vmem:[%s4535_s16 + $0x28] sm:$0xff] %vm2247_vm1, %v2114_v57  ;;  %v2109_v25 = vadd.f32 %v4528_v13, %v2108_v62 }
 0x4dc   : > { %v2697_v1 = vpop.f32.mrf.mxu0 }
 0x4dd   : > { %2252 = vst.msk [vmem:[%s4535_s16 + $0x20] sm:$0xff] %vm2247_vm1, %v2109_v25  ;;  %v2124_v40 = vadd.f32 %v2697_v1, %v4528_v13 }
 0x4de   : > { %v2118_v54 = vpop.f32.mrf.mxu0 }
 0x4df   : > { %2255 = vst.msk [vmem:[%s4535_s16 + $0x38] sm:$0xff] %vm2247_vm1, %v2124_v40  ;;  %v2119_v42 = vadd.f32 %v4528_v13, %v2118_v54 }
 0x4e0   : > { %v2700_v41 = vpop.f32.mrf.mxu0 }
 0x4e1   : > { %2254 = vst.msk [vmem:[%s4535_s16 + $0x30] sm:$0xff] %vm2247_vm1, %v2119_v42  ;;  %v2134_v2 = vadd.f32 %v2700_v41, %v4528_v13 }
 0x4e2   : > { %v2128_v35 = vpop.f32.mrf.mxu0 }
 0x4e3   : > { %2257 = vst.msk [vmem:[%s4535_s16 + $0x48] sm:$0xff] %vm2247_vm1, %v2134_v2  ;;  %v2129_v31 = vadd.f32 %v4528_v13, %v2128_v35 }
 0x4e4   : > { %v2703_v30 = vpop.f32.mrf.mxu0 }
 0x4e5   : > { %2256 = vst.msk [vmem:[%s4535_s16 + $0x40] sm:$0xff] %vm2247_vm1, %v2129_v31  ;;  %v2144_v60 = vadd.f32 %v2703_v30, %v4528_v13 }
 0x4e6   : > { %v2138_v24 = vpop.f32.mrf.mxu0 }
 0x4e7   : > { %2259 = vst.msk [vmem:[%s4535_s16 + $0x58] sm:$0xff] %vm2247_vm1, %v2144_v60  ;;  %v2139_v45 = vadd.f32 %v4528_v13, %v2138_v24 }
 0x4e8   : > { %v2706_v22 = vpop.f32.mrf.mxu0 }
 0x4e9   : > { %2258 = vst.msk [vmem:[%s4535_s16 + $0x50] sm:$0xff] %vm2247_vm1, %v2139_v45  ;;  %v2154_v56 = vadd.f32 %v2706_v22, %v4528_v13 }
 0x4ea   : > { %v2148_v50 = vpop.f32.mrf.mxu0 }
 0x4eb   : > { %2261 = vst.msk [vmem:[%s4535_s16 + $0x68] sm:$0xff] %vm2247_vm1, %v2154_v56  ;;  %v2149_v53 = vadd.f32 %v4528_v13, %v2148_v50 }
 0x4ec   : > { %v2709_v32 = vpop.f32.mrf.mxu0 }
 0x4ed   : > { %2260 = vst.msk [vmem:[%s4535_s16 + $0x60] sm:$0xff] %vm2247_vm1, %v2149_v53  ;;  %v2164_v37 = vadd.f32 %v2709_v32, %v4528_v13 }
 0x4ee   : > { %v2158_v0 = vpop.f32.mrf.mxu0 }
 0x4ef   : > { %2263 = vst.msk [vmem:[%s4535_s16 + $0x78] sm:$0xff] %vm2247_vm1, %v2164_v37  ;;  %v2159_v61 = vadd.f32 %v4528_v13, %v2158_v0 }
 0x4f0   : > { %v2712_v26 = vpop.f32.mrf.mxu0 }
 0x4f1   : > { %2262 = vst.msk [vmem:[%s4535_s16 + $0x70] sm:$0xff] %vm2247_vm1, %v2159_v61  ;;  %v2174_v7 = vadd.f32 %v2712_v26, %v4528_v13 }
 0x4f2   : > { %v2168_v47 = vpop.f32.mrf.mxu0 }
 0x4f3   : > { %2265 = vst.msk [vmem:[%s4535_s16 + $0x88] sm:$0xff] %vm2247_vm1, %v2174_v7  ;;  %v2169_v58 = vadd.f32 %v4528_v13, %v2168_v47 }
 0x4f4   : > { %v2715_v44 = vpop.f32.mrf.mxu0 }
 0x4f5   : > { %2264 = vst.msk [vmem:[%s4535_s16 + $0x80] sm:$0xff] %vm2247_vm1, %v2169_v58  ;;  %v2184_v38 = vadd.f32 %v2715_v44, %v4528_v13 }
 0x4f6   : > { %v2178_v4 = vpop.f32.mrf.mxu0 }
 0x4f7   : > { %2267 = vst.msk [vmem:[%s4535_s16 + $0x98] sm:$0xff] %vm2247_vm1, %v2184_v38  ;;  %v2179_v49 = vadd.f32 %v4528_v13, %v2178_v4 }
 0x4f8   : > { %v2718_v27 = vpop.f32.mrf.mxu0 }
 0x4f9   : > { %2266 = vst.msk [vmem:[%s4535_s16 + $0x90] sm:$0xff] %vm2247_vm1, %v2179_v49  ;;  %v2194_v28 = vadd.f32 %v2718_v27, %v4528_v13 }
 0x4fa   : > { %v2188_v23 = vpop.f32.mrf.mxu0 }
 0x4fb   : > { %2269 = vst.msk [vmem:[%s4535_s16 + $0xa8] sm:$0xff] %vm2247_vm1, %v2194_v28  ;;  %v2189_v21 = vadd.f32 %v4528_v13, %v2188_v23 }
 0x4fc   : > { %v2721_v46 = vpop.f32.mrf.mxu0 }
 0x4fd   : > { %2268 = vst.msk [vmem:[%s4535_s16 + $0xa0] sm:$0xff] %vm2247_vm1, %v2189_v21  ;;  %v2204_v18 = vadd.f32 %v2721_v46, %v4528_v13 }
 0x4fe   : > { %v2198_v51 = vpop.f32.mrf.mxu0 }
 0x4ff   : > { %2271 = vst.msk [vmem:[%s4535_s16 + $0xb8] sm:$0xff] %vm2247_vm1, %v2204_v18  ;;  %v2199_v29 = vadd.f32 %v4528_v13, %v2198_v51 }
 0x500   : > { %v2724_v34 = vpop.f32.mrf.mxu0 }
 0x501   : > { %2270 = vst.msk [vmem:[%s4535_s16 + $0xb0] sm:$0xff] %vm2247_vm1, %v2199_v29  ;;  %v2214_v48 = vadd.f32 %v2724_v34, %v4528_v13 }
 0x502   : > { %v2208_v39 = vpop.f32.mrf.mxu0 }
 0x503   : > { %2273 = vst.msk [vmem:[%s4535_s16 + $0xc8] sm:$0xff] %vm2247_vm1, %v2214_v48  ;;  %v2209_v43 = vadd.f32 %v4528_v13, %v2208_v39 }
 0x504   : > { %v2727_v55 = vpop.f32.mrf.mxu0 }
 0x505   : > { %2272 = vst.msk [vmem:[%s4535_s16 + $0xc0] sm:$0xff] %vm2247_vm1, %v2209_v43  ;;  %v2224_v11 = vadd.f32 %v2727_v55, %v4528_v13 }
 0x506   : > { %v2218_v63 = vpop.f32.mrf.mxu0 }
 0x507   : > { %2275 = vst.msk [vmem:[%s4535_s16 + $0xd8] sm:$0xff] %vm2247_vm1, %v2224_v11  ;;  %v2219_v12 = vadd.f32 %v4528_v13, %v2218_v63 }
 0x508   : > { %v2730_v20 = vpop.f32.mrf.mxu0 }
 0x509   : > { %2274 = vst.msk [vmem:[%s4535_s16 + $0xd0] sm:$0xff] %vm2247_vm1, %v2219_v12  ;;  %v2234_v17 = vadd.f32 %v2730_v20, %v4528_v13 }
 0x50a   : > { %v2228_v33 = vpop.f32.mrf.mxu0 }
 0x50b   : > { %2277 = vst.msk [vmem:[%s4535_s16 + $0xe8] sm:$0xff] %vm2247_vm1, %v2234_v17  ;;  %v2229_v8 = vadd.f32 %v4528_v13, %v2228_v33 }
 0x50c   : > { %v2733_v16 = vpop.f32.mrf.mxu0 }
 0x50d   : > { %2276 = vst.msk [vmem:[%s4535_s16 + $0xe0] sm:$0xff] %vm2247_vm1, %v2229_v8  ;;  %v2244_v5 = vadd.f32 %v2733_v16, %v4528_v13 }
 0x50e   : > { %v2238_v3 = vpop.f32.mrf.mxu0 }
 0x50f   : > { %2279 = vst.msk [vmem:[%s4535_s16 + $0xf8] sm:$0xff] %vm2247_vm1, %v2244_v5  ;;  %v2239_v10 = vadd.f32 %v4528_v13, %v2238_v3 }
 0x511   : > { %2278 = vst.msk [vmem:[%s4535_s16 + $0xf0] sm:$0xff] %vm2247_vm1, %v2239_v10 }
 0x512 PF: > { %s17_s24 = sadd.s32 1, %s2884_s24  }
 0x513   : > { %p14_p4 = scmp.ge.s32.totalorder %s17_s24, 4  }
 0x515   :  { %16 = sbr.rel (!%p14_p4) target bundleno = 1 (0x1), region = 78 }

</bundles_post_ra>
